<compile_context>
chip_gen: v7x
topology: tpu7x:2x2x1
jax: 0.10.0
libtpu: 0.0.40
codegen_flags: <defaults>
</compile_context>

<pallas_src>
import functools

import jax
import jax.numpy as jnp
import numpy as np
from jax import lax
from jax.experimental import pallas as pl
from jax.experimental.pallas import tpu as pltpu

LN_EPS = 1e-5  # torch.nn.LayerNorm default
_VMEM_SLACK = 8 << 20  # compiler scratch headroom


def _layer_norm(v, gamma, beta):
    # v: (M, C) f32, gamma/beta: (C,) f32.  Biased variance (matches torch).
    mu = jnp.mean(v, axis=-1, keepdims=True)
    var = jnp.mean((v - mu) ** 2, axis=-1, keepdims=True)
    return (v - mu) * lax.rsqrt(var + LN_EPS) * gamma + beta


def transformer_layer_kernel(
    x_ref,        # (block_b, N, C)   input dtype
    wqkv_ref,     # (C, 3C)           bf16   [Wq*scale | Wk | Wv], no bias (bias=False)
    wo_ref,       # (C, C)            bf16   attention output projection
    w1_ref,       # (C, H)            bf16   mlp.fc1
    w2_ref,       # (H, C)            bf16   mlp.fc2
    vecs_ref,     # (8, C)            f32    [ln1_g, ln1_b, ln2_g, ln2_b, proj_b, fc2_b, 0, 0]
    fc1b_ref,     # (1, H)            f32    mlp.fc1 bias
    o_ref,        # (block_b, N, C)
    *,
    num_heads,
):
    f32 = jnp.float32
    bf16 = jnp.bfloat16

    Bt, N, C = x_ref.shape
    hd = C // num_heads

    # Work on a 2D (Bt*N, C) slab for the dense projections (MXU-friendly, no batch dims).
    x = x_ref[...].astype(f32).reshape(Bt * N, C)

    vecs = vecs_ref[...]
    ln1_g, ln1_b = vecs[0], vecs[1]
    ln2_g, ln2_b = vecs[2], vecs[3]
    proj_b, fc2_b = vecs[4], vecs[5]

    # ---------------- attention: x + project(attn(norm1(x))) ----------------
    xn = _layer_norm(x, ln1_g, ln1_b)                                     # (Bt*N, C) f32
    qkv = jnp.dot(xn.astype(bf16), wqkv_ref[...],
                  preferred_element_type=f32)                             # (Bt*N, 3C) f32
    qkv = qkv.astype(bf16).reshape(Bt, N, 3 * C)

    def heads_to_batch(t):
        # (Bt, N, C) -> (num_heads*Bt, N, hd): fold heads into the leading batch axis
        # so a single batched einsum / softmax handles all heads at once.
        return jnp.concatenate(
            [t[:, :, h * hd:(h + 1) * hd] for h in range(num_heads)], axis=0)

    q = heads_to_batch(qkv[:, :, :C])            # scale pre-folded into Wq (host-side)
    k = heads_to_batch(qkv[:, :, C:2 * C])
    v = heads_to_batch(qkv[:, :, 2 * C:])

    # q . k^T via batched dot_general contraction -- no explicit transpose.
    s = jnp.einsum('bnd,bmd->bnm', q, k,
                   preferred_element_type=f32)                            # (h*Bt, N, N) f32
    s = s - jnp.max(s, axis=-1, keepdims=True)
    e = jnp.exp(s)
    p = e * pl.reciprocal(jnp.sum(e, axis=-1, keepdims=True), approx=True)
    o = jnp.einsum('bnm,bmd->bnd', p.astype(bf16), v,
                   preferred_element_type=f32)                            # (h*Bt, N, hd) f32

    # un-fold heads back into the lane dimension: (h*Bt, N, hd) -> (Bt, N, C)
    attn = jnp.concatenate([o[h * Bt:(h + 1) * Bt] for h in range(num_heads)], axis=-1)
    attn = attn.reshape(Bt * N, C)
    attn = jnp.dot(attn.astype(bf16), wo_ref[...],
                   preferred_element_type=f32) + proj_b
    x = x + attn

    # ---------------- MLP: x + fc2(relu(fc1(norm2(x)))) ----------------
    xn2 = _layer_norm(x, ln2_g, ln2_b)
    h1 = jnp.dot(xn2.astype(bf16), w1_ref[...],
                 preferred_element_type=f32) + fc1b_ref[...]              # (Bt*N, H)
    h1 = jnp.maximum(h1, 0.0)                                             # nnf.relu
    mlp = jnp.dot(h1.astype(bf16), w2_ref[...],
                  preferred_element_type=f32) + fc2_b
    x = x + mlp

    o_ref[...] = x.reshape(Bt, N, C).astype(o_ref.dtype)


def _physical_vmem_bytes():
    try:
        info = pltpu.get_tpu_info()
        cap = getattr(info, "vmem_capacity_bytes", None)
        if cap:
            return int(cap)
    except Exception:
        pass
    return 64 << 20  # conservative (v7x-sized) fallback


def _pick_block_b(B, N):
    # Prefer >= 256 rows/step (then >= 128) with an EVEN grid extent so v7x's two
    # TensorCores both get work; if B*N is too small for that, process the whole
    # batch in one step (fewer, fatter steps win on the single-TC v5e/v6e).
    divisors = [d for d in range(1, B + 1) if B % d == 0]
    for min_rows in (256, 128):
        cands = [d for d in divisors if d * N >= min_rows and (B // d) % 2 == 0]
        if cands:
            return min(cands)
    return B


def _step_vmem_bytes(block_b, N, C, H, num_heads, weight_bytes, x_itemsize):
    # Double-buffered weights + double-buffered in/out activation blocks + the live
    # f32 intermediates (qkv 3C-wide, h1/relu H-wide, batched scores heads*N-wide,
    # residual / normalized copies) per row.
    rows = block_b * N
    act_block = rows * C * x_itemsize
    per_row_f32_words = 12 * C + 3 * H + 4 * num_heads * N
    inter = rows * 4 * per_row_f32_words
    return 2 * weight_bytes + 4 * act_block + inter


def transformer_layer_pallas(x, params, *, num_heads, block_b=None):
    """TransformerLayer forward. x: (B, N, C); params: see init_transformer_layer_params."""
    B, N, C = x.shape
    H = params["w1"].shape[1]
    assert C % num_heads == 0, "dim_self must be divisible by num_heads"
    scale = float((C // num_heads) ** -0.5)

    weight_bytes = sum(int(params[k].size) * params[k].dtype.itemsize
                       for k in ("w_qkv", "w_o", "w1", "w2", "vecs", "fc1_b"))

    # VMEM cap: ~3/4 of physical (96 MiB on v5e/v6e's 128 MiB, 48 MiB on v7x's 64 MiB).
    vmem_cap = (_physical_vmem_bytes() * 3) // 4

    if block_b is None:
        block_b = _pick_block_b(B, N)
        # Shrink if the intermediate-aware per-step working set would exceed the cap.
        while (block_b > 1 and
               _step_vmem_bytes(block_b, N, C, H, num_heads, weight_bytes,
                                x.dtype.itemsize) + _VMEM_SLACK > vmem_cap):
            block_b = max(d for d in range(1, block_b) if B % d == 0)
    assert B % block_b == 0, "batch must be divisible by block_b"

    # Fold the attention scale into the Wq third of the fused QKV weight (host-side,
    # one-off): removes the per-step VPU multiply over the (heads, N, N) score slab.
    w_qkv = params["w_qkv"]
    w_qkv = jnp.concatenate(
        [(w_qkv[:, :C].astype(jnp.float32) * scale).astype(w_qkv.dtype),
         w_qkv[:, C:]], axis=1)

    grid = (B // block_b,)
    kernel = functools.partial(transformer_layer_kernel, num_heads=num_heads)

    # Weights use a constant block index -> fetched once, resident across the grid.
    wspec = lambda shape: pl.BlockSpec(shape, lambda b: (0, 0))

    # Advisory cost estimate for XLA scheduling.
    flops = 2 * B * N * (3 * C * C + 2 * N * C + C * C + 2 * C * H)
    transcendentals = B * num_heads * N * N          # softmax exps
    bytes_accessed = 2 * x.size * x.dtype.itemsize + weight_bytes
    cost = pl.CostEstimate(flops=flops, transcendentals=transcendentals,
                           bytes_accessed=bytes_accessed)

    step_bytes = _step_vmem_bytes(block_b, N, C, H, num_heads, weight_bytes,
                                  x.dtype.itemsize)
    vmem_limit = int(min(max(step_bytes + _VMEM_SLACK, 32 << 20), vmem_cap))

    out = pl.pallas_call(
        kernel,
        out_shape=jax.ShapeDtypeStruct((B, N, C), x.dtype),
        grid_spec=pltpu.PrefetchScalarGridSpec(
            num_scalar_prefetch=0,
            grid=grid,
            in_specs=[
                pl.BlockSpec((block_b, N, C), lambda b: (b, 0, 0)),
                wspec((C, 3 * C)),
                wspec((C, C)),
                wspec((C, H)),
                wspec((H, C)),
                wspec((8, C)),
                wspec((1, H)),
            ],
            out_specs=pl.BlockSpec((block_b, N, C), lambda b: (b, 0, 0)),
        ),
        compiler_params=pltpu.CompilerParams(
            dimension_semantics=("parallel",),
            vmem_limit_bytes=vmem_limit,
        ),
        cost_estimate=cost,
    )(x, w_qkv, params["w_o"], params["w1"], params["w2"],
      params["vecs"], params["fc1_b"])
    return out


# ---------------- parameter construction (deterministic, synthetic) ----------------
def init_transformer_layer_params(key, dim, hidden):
    """Returns (master_f32_params_for_reference, kernel_params)."""
    ks = jax.random.split(key, 7)
    s = 0.02
    # Round matmul weights to bf16-representable values so kernel (bf16) and
    # reference (f32) consume identical weight values.
    rnd = lambda a: a.astype(jnp.bfloat16).astype(jnp.float32)

    master = {
        "ln1_g": jnp.ones((dim,), jnp.float32),
        "ln1_b": jnp.zeros((dim,), jnp.float32),
        "ln2_g": jnp.ones((dim,), jnp.float32),
        "ln2_b": jnp.zeros((dim,), jnp.float32),
        # to_queries / to_keys_values fused, stored (in, out), bias=False
        "w_qkv": rnd(s * jax.random.normal(ks[0], (dim, 3 * dim), jnp.float32)),
        # attention output projection (bias=True)
        "w_o": rnd(s * jax.random.normal(ks[1], (dim, dim), jnp.float32)),
        "proj_b": rnd(s * jax.random.normal(ks[2], (dim,), jnp.float32)),
        # MLP: Linear(dim -> hidden), relu, Linear(hidden -> dim)
        "w1": rnd(s * jax.random.normal(ks[3], (dim, hidden), jnp.float32)),
        "fc1_b": rnd(s * jax.random.normal(ks[4], (hidden,), jnp.float32)),
        "w2": rnd(s * jax.random.normal(ks[5], (hidden, dim), jnp.float32)),
        "fc2_b": rnd(s * jax.random.normal(ks[6], (dim,), jnp.float32)),
    }

    zeros = jnp.zeros((dim,), jnp.float32)
    kernel_params = {
        "w_qkv": master["w_qkv"].astype(jnp.bfloat16),
        "w_o": master["w_o"].astype(jnp.bfloat16),
        "w1": master["w1"].astype(jnp.bfloat16),
        "w2": master["w2"].astype(jnp.bfloat16),
        # small vector params consolidated into one (8, C) f32 tile
        "vecs": jnp.stack([master["ln1_g"], master["ln1_b"],
                           master["ln2_g"], master["ln2_b"],
                           master["proj_b"], master["fc2_b"],
                           zeros, zeros], axis=0),
        "fc1_b": master["fc1_b"][None, :],
    }
    return master, kernel_params


# ---------------- pure-JAX reference (mirrors the PyTorch forward, f32) ----------------
def transformer_layer_reference(x, p, num_heads):
    B, N, C = x.shape
    hd = C // num_heads
    scale = hd ** -0.5

    def ln(v, g, b):
        mu = jnp.mean(v, axis=-1, keepdims=True)
        var = jnp.mean((v - mu) ** 2, axis=-1, keepdims=True)
        return (v - mu) / jnp.sqrt(var + LN_EPS) * g + b

    # attention
    xn = ln(x, p["ln1_g"], p["ln1_b"])
    qkv = xn @ p["w_qkv"]                                  # (B, N, 3C)
    q = qkv[..., :C].reshape(B, N, num_heads, hd)
    k = qkv[..., C:2 * C].reshape(B, N, num_heads, hd)
    v = qkv[..., 2 * C:].reshape(B, N, num_heads, hd)
    att = jnp.einsum('bnhd,bmhd->bnmh', q, k) * scale
    att = jax.nn.softmax(att, axis=2)
    out = jnp.einsum('bnmh,bmhd->bnhd', att, v).reshape(B, N, C)
    out = out @ p["w_o"] + p["proj_b"]
    x = x + out

    # MLP
    xn2 = ln(x, p["ln2_g"], p["ln2_b"])
    h1 = jax.nn.relu(xn2 @ p["w1"] + p["fc1_b"])
    x = x + (h1 @ p["w2"] + p["fc2_b"])
    return x


if __name__ == "__main__":
    # Small shapes consistent with the module: x is (batch, seq, dim_self).
    # C = 128 keeps the lane dimension dense; num_heads=4 -> head_dim=32; mlp_ratio=4.
    B, N, C = 2, 16, 128
    num_heads = 4
    H = int(C * 4.0)

    key = jax.random.PRNGKey(0)
    key, xk = jax.random.split(key)
    x = jax.random.normal(xk, (B, N, C), jnp.float32)

    master, kparams = init_transformer_layer_params(key, C, H)

    out = transformer_layer_pallas(x, kparams, num_heads=num_heads)
    out = jax.block_until_ready(out)

    ref = transformer_layer_reference(x, master, num_heads)
    # bf16 matmul operands in the kernel -> loosened tolerance vs. the f32 reference.
    np.testing.assert_allclose(np.asarray(out), np.asarray(ref), rtol=2e-2, atol=2e-2)

    print("KERNEL_OK")
</pallas_src>

<mosaic_0001>
module attributes {stable_mosaic.version = 11 : i64} {
  func.func @transformer_layer_kernel(%arg0: i32, %arg1: memref<2x16x128xf32, #tpu.memory_space<vmem>>, %arg2: memref<128x384xbf16, #tpu.memory_space<vmem>>, %arg3: memref<128x128xbf16, #tpu.memory_space<vmem>>, %arg4: memref<128x512xbf16, #tpu.memory_space<vmem>>, %arg5: memref<512x128xbf16, #tpu.memory_space<vmem>>, %arg6: memref<8x128xf32, #tpu.memory_space<vmem>>, %arg7: memref<1x512xf32, #tpu.memory_space<vmem>>, %arg8: memref<2x16x128xf32, #tpu.memory_space<vmem>>) attributes {dimension_semantics = [#tpu.dimension_semantics<parallel>], iteration_bounds = array<i64: 1>, scalar_prefetch = 0 : i64, scratch_operands = 0 : i64, tpu.core_type = #tpu.core_type<tc>, window_params = [{transform_indices = @transform_0, window_bounds = array<i64: 2, 16, 128>}, {pipeline_mode = #tpu.pipeline_mode<synchronous>, transform_indices = @transform_1, window_bounds = array<i64: 128, 384>}, {pipeline_mode = #tpu.pipeline_mode<synchronous>, transform_indices = @transform_2, window_bounds = array<i64: 128, 128>}, {pipeline_mode = #tpu.pipeline_mode<synchronous>, transform_indices = @transform_3, window_bounds = array<i64: 128, 512>}, {pipeline_mode = #tpu.pipeline_mode<synchronous>, transform_indices = @transform_4, window_bounds = array<i64: 512, 128>}, {pipeline_mode = #tpu.pipeline_mode<synchronous>, transform_indices = @transform_5, window_bounds = array<i64: 8, 128>}, {pipeline_mode = #tpu.pipeline_mode<synchronous>, transform_indices = @transform_6, window_bounds = array<i64: 1, 512>}, {transform_indices = @transform_7, window_bounds = array<i64: 2, 16, 128>}]} {
    %c0 = arith.constant 0 : index
    %c0_0 = arith.constant 0 : index
    %c0_1 = arith.constant 0 : index
    %0 = vector.load %arg1[%c0, %c0_0, %c0_1] : memref<2x16x128xf32, #tpu.memory_space<vmem>>, vector<2x16x128xf32>
    %1 = vector.shape_cast %0 : vector<2x16x128xf32> to vector<32x128xf32>
    %c0_2 = arith.constant 0 : index
    %c0_3 = arith.constant 0 : index
    %2 = vector.load %arg6[%c0_2, %c0_3] : memref<8x128xf32, #tpu.memory_space<vmem>>, vector<8x128xf32>
    %3 = vector.extract_strided_slice %2 {offsets = [0, 0], sizes = [1, 128], strides = [1, 1]} : vector<8x128xf32> to vector<1x128xf32>
    %4 = vector.shape_cast %3 : vector<1x128xf32> to vector<128xf32>
    %5 = vector.extract_strided_slice %2 {offsets = [1, 0], sizes = [1, 128], strides = [1, 1]} : vector<8x128xf32> to vector<1x128xf32>
    %6 = vector.shape_cast %5 : vector<1x128xf32> to vector<128xf32>
    %7 = vector.extract_strided_slice %2 {offsets = [2, 0], sizes = [1, 128], strides = [1, 1]} : vector<8x128xf32> to vector<1x128xf32>
    %8 = vector.shape_cast %7 : vector<1x128xf32> to vector<128xf32>
    %9 = vector.extract_strided_slice %2 {offsets = [3, 0], sizes = [1, 128], strides = [1, 1]} : vector<8x128xf32> to vector<1x128xf32>
    %10 = vector.shape_cast %9 : vector<1x128xf32> to vector<128xf32>
    %11 = vector.extract_strided_slice %2 {offsets = [4, 0], sizes = [1, 128], strides = [1, 1]} : vector<8x128xf32> to vector<1x128xf32>
    %12 = vector.shape_cast %11 : vector<1x128xf32> to vector<128xf32>
    %13 = vector.extract_strided_slice %2 {offsets = [5, 0], sizes = [1, 128], strides = [1, 1]} : vector<8x128xf32> to vector<1x128xf32>
    %14 = vector.shape_cast %13 : vector<1x128xf32> to vector<128xf32>
    %cst = arith.constant dense<0.000000e+00> : vector<32xf32>
    %15 = vector.multi_reduction <add>, %1, %cst [1] : vector<32x128xf32> to vector<32xf32>
    %16 = vector.shape_cast %15 : vector<32xf32> to vector<32x1xf32>
    %cst_4 = arith.constant 1.280000e+02 : f32
    %17 = vector.broadcast %cst_4 : f32 to vector<32x1xf32>
    %18 = arith.divf %16, %17 : vector<32x1xf32>
    %19 = vector.broadcast %18 : vector<32x1xf32> to vector<32x128xf32>
    %20 = arith.subf %1, %19 : vector<32x128xf32>
    %21 = arith.mulf %20, %20 : vector<32x128xf32>
    %cst_5 = arith.constant dense<0.000000e+00> : vector<32xf32>
    %22 = vector.multi_reduction <add>, %21, %cst_5 [1] : vector<32x128xf32> to vector<32xf32>
    %23 = vector.shape_cast %22 : vector<32xf32> to vector<32x1xf32>
    %cst_6 = arith.constant 1.280000e+02 : f32
    %24 = vector.broadcast %cst_6 : f32 to vector<32x1xf32>
    %25 = arith.divf %23, %24 : vector<32x1xf32>
    %26 = vector.broadcast %18 : vector<32x1xf32> to vector<32x128xf32>
    %27 = arith.subf %1, %26 : vector<32x128xf32>
    %cst_7 = arith.constant 9.99999974E-6 : f32
    %28 = vector.broadcast %cst_7 : f32 to vector<32x1xf32>
    %29 = arith.addf %25, %28 : vector<32x1xf32>
    %30 = math.rsqrt %29 : vector<32x1xf32>
    %31 = vector.broadcast %30 : vector<32x1xf32> to vector<32x128xf32>
    %32 = arith.mulf %27, %31 : vector<32x128xf32>
    %33 = vector.shape_cast %4 : vector<128xf32> to vector<1x128xf32>
    %34 = vector.broadcast %33 : vector<1x128xf32> to vector<32x128xf32>
    %35 = arith.mulf %32, %34 : vector<32x128xf32>
    %36 = vector.shape_cast %6 : vector<128xf32> to vector<1x128xf32>
    %37 = vector.broadcast %36 : vector<1x128xf32> to vector<32x128xf32>
    %38 = arith.addf %35, %37 : vector<32x128xf32>
    %39 = arith.truncf %38 : vector<32x128xf32> to vector<32x128xbf16>
    %c0_8 = arith.constant 0 : index
    %c0_9 = arith.constant 0 : index
    %40 = vector.load %arg2[%c0_8, %c0_9] : memref<128x384xbf16, #tpu.memory_space<vmem>>, vector<128x384xbf16>
    %cst_10 = arith.constant dense<0.000000e+00> : vector<32x384xf32>
    %41 = tpu.matmul %39, %40, %cst_10 {dimension_numbers = #tpu.dot_dimension_numbers<[1], [0], [0], [1], [0, 0, 1, 1], [], []>} : vector<32x128xbf16>, vector<128x384xbf16>, vector<32x384xf32> -> vector<32x384xf32>
    %42 = arith.truncf %41 : vector<32x384xf32> to vector<32x384xbf16>
    %43 = vector.shape_cast %42 : vector<32x384xbf16> to vector<2x16x384xbf16>
    %44 = vector.extract_strided_slice %43 {offsets = [0, 0, 0], sizes = [2, 16, 128], strides = [1, 1, 1]} : vector<2x16x384xbf16> to vector<2x16x128xbf16>
    %45 = vector.extract_strided_slice %44 {offsets = [0, 0, 0], sizes = [2, 16, 32], strides = [1, 1, 1]} : vector<2x16x128xbf16> to vector<2x16x32xbf16>
    %46 = vector.extract_strided_slice %44 {offsets = [0, 0, 32], sizes = [2, 16, 32], strides = [1, 1, 1]} : vector<2x16x128xbf16> to vector<2x16x32xbf16>
    %47 = vector.extract_strided_slice %44 {offsets = [0, 0, 64], sizes = [2, 16, 32], strides = [1, 1, 1]} : vector<2x16x128xbf16> to vector<2x16x32xbf16>
    %48 = vector.extract_strided_slice %44 {offsets = [0, 0, 96], sizes = [2, 16, 32], strides = [1, 1, 1]} : vector<2x16x128xbf16> to vector<2x16x32xbf16>
    %49 = tpu.concatenate %45, %46, %47, %48 in 0 : vector<2x16x32xbf16>, vector<2x16x32xbf16>, vector<2x16x32xbf16>, vector<2x16x32xbf16> -> vector<8x16x32xbf16>
    %50 = vector.extract_strided_slice %43 {offsets = [0, 0, 128], sizes = [2, 16, 128], strides = [1, 1, 1]} : vector<2x16x384xbf16> to vector<2x16x128xbf16>
    %51 = vector.extract_strided_slice %50 {offsets = [0, 0, 0], sizes = [2, 16, 32], strides = [1, 1, 1]} : vector<2x16x128xbf16> to vector<2x16x32xbf16>
    %52 = vector.extract_strided_slice %50 {offsets = [0, 0, 32], sizes = [2, 16, 32], strides = [1, 1, 1]} : vector<2x16x128xbf16> to vector<2x16x32xbf16>
    %53 = vector.extract_strided_slice %50 {offsets = [0, 0, 64], sizes = [2, 16, 32], strides = [1, 1, 1]} : vector<2x16x128xbf16> to vector<2x16x32xbf16>
    %54 = vector.extract_strided_slice %50 {offsets = [0, 0, 96], sizes = [2, 16, 32], strides = [1, 1, 1]} : vector<2x16x128xbf16> to vector<2x16x32xbf16>
    %55 = tpu.concatenate %51, %52, %53, %54 in 0 : vector<2x16x32xbf16>, vector<2x16x32xbf16>, vector<2x16x32xbf16>, vector<2x16x32xbf16> -> vector<8x16x32xbf16>
    %56 = vector.extract_strided_slice %43 {offsets = [0, 0, 256], sizes = [2, 16, 128], strides = [1, 1, 1]} : vector<2x16x384xbf16> to vector<2x16x128xbf16>
    %57 = vector.extract_strided_slice %56 {offsets = [0, 0, 0], sizes = [2, 16, 32], strides = [1, 1, 1]} : vector<2x16x128xbf16> to vector<2x16x32xbf16>
    %58 = vector.extract_strided_slice %56 {offsets = [0, 0, 32], sizes = [2, 16, 32], strides = [1, 1, 1]} : vector<2x16x128xbf16> to vector<2x16x32xbf16>
    %59 = vector.extract_strided_slice %56 {offsets = [0, 0, 64], sizes = [2, 16, 32], strides = [1, 1, 1]} : vector<2x16x128xbf16> to vector<2x16x32xbf16>
    %60 = vector.extract_strided_slice %56 {offsets = [0, 0, 96], sizes = [2, 16, 32], strides = [1, 1, 1]} : vector<2x16x128xbf16> to vector<2x16x32xbf16>
    %61 = tpu.concatenate %57, %58, %59, %60 in 0 : vector<2x16x32xbf16>, vector<2x16x32xbf16>, vector<2x16x32xbf16>, vector<2x16x32xbf16> -> vector<8x16x32xbf16>
    "tpu.trace_start"() <{level = 10 : i32, message = "bnd,bmd->bnm"}> : () -> ()
    %cst_11 = arith.constant dense<0.000000e+00> : vector<8x16x16xf32>
    %62 = tpu.matmul %49, %55, %cst_11 {dimension_numbers = #tpu.dot_dimension_numbers<[2], [2], [1], [1], [0, 0, 0, 1, 1, 1], [0], [0]>} : vector<8x16x32xbf16>, vector<8x16x32xbf16>, vector<8x16x16xf32> -> vector<8x16x16xf32>
    "tpu.trace_stop"() : () -> ()
    %cst_12 = arith.constant dense<0xFF800000> : vector<8x16xf32>
    %63 = vector.multi_reduction <maximumf>, %62, %cst_12 [2] : vector<8x16x16xf32> to vector<8x16xf32>
    %64 = vector.shape_cast %63 : vector<8x16xf32> to vector<8x16x1xf32>
    %65 = vector.broadcast %64 : vector<8x16x1xf32> to vector<8x16x16xf32>
    %66 = arith.subf %62, %65 : vector<8x16x16xf32>
    %67 = math.exp %66 : vector<8x16x16xf32>
    %cst_13 = arith.constant dense<0.000000e+00> : vector<8x16xf32>
    %68 = vector.multi_reduction <add>, %67, %cst_13 [2] : vector<8x16x16xf32> to vector<8x16xf32>
    %69 = vector.shape_cast %68 : vector<8x16xf32> to vector<8x16x1xf32>
    %70 = tpu.reciprocal %69 {approx = true} : vector<8x16x1xf32> -> vector<8x16x1xf32>
    %71 = vector.broadcast %70 : vector<8x16x1xf32> to vector<8x16x16xf32>
    %72 = arith.mulf %67, %71 : vector<8x16x16xf32>
    %73 = arith.truncf %72 : vector<8x16x16xf32> to vector<8x16x16xbf16>
    "tpu.trace_start"() <{level = 10 : i32, message = "bnm,bmd->bnd"}> : () -> ()
    %cst_14 = arith.constant dense<0.000000e+00> : vector<8x16x32xf32>
    %74 = tpu.matmul %73, %61, %cst_14 {dimension_numbers = #tpu.dot_dimension_numbers<[2], [1], [1], [2], [0, 0, 0, 1, 1, 2], [0], [0]>} : vector<8x16x16xbf16>, vector<8x16x32xbf16>, vector<8x16x32xf32> -> vector<8x16x32xf32>
    "tpu.trace_stop"() : () -> ()
    %75 = vector.extract_strided_slice %74 {offsets = [0, 0, 0], sizes = [2, 16, 32], strides = [1, 1, 1]} : vector<8x16x32xf32> to vector<2x16x32xf32>
    %76 = vector.extract_strided_slice %74 {offsets = [2, 0, 0], sizes = [2, 16, 32], strides = [1, 1, 1]} : vector<8x16x32xf32> to vector<2x16x32xf32>
    %77 = vector.extract_strided_slice %74 {offsets = [4, 0, 0], sizes = [2, 16, 32], strides = [1, 1, 1]} : vector<8x16x32xf32> to vector<2x16x32xf32>
    %78 = vector.extract_strided_slice %74 {offsets = [6, 0, 0], sizes = [2, 16, 32], strides = [1, 1, 1]} : vector<8x16x32xf32> to vector<2x16x32xf32>
    %79 = tpu.concatenate %75, %76, %77, %78 in 2 : vector<2x16x32xf32>, vector<2x16x32xf32>, vector<2x16x32xf32>, vector<2x16x32xf32> -> vector<2x16x128xf32>
    %80 = vector.shape_cast %79 : vector<2x16x128xf32> to vector<32x128xf32>
    %81 = arith.truncf %80 : vector<32x128xf32> to vector<32x128xbf16>
    %c0_15 = arith.constant 0 : index
    %c0_16 = arith.constant 0 : index
    %82 = vector.load %arg3[%c0_15, %c0_16] : memref<128x128xbf16, #tpu.memory_space<vmem>>, vector<128x128xbf16>
    %cst_17 = arith.constant dense<0.000000e+00> : vector<32x128xf32>
    %83 = tpu.matmul %81, %82, %cst_17 {dimension_numbers = #tpu.dot_dimension_numbers<[1], [0], [0], [1], [0, 0, 1, 1], [], []>} : vector<32x128xbf16>, vector<128x128xbf16>, vector<32x128xf32> -> vector<32x128xf32>
    %84 = vector.shape_cast %12 : vector<128xf32> to vector<1x128xf32>
    %85 = vector.broadcast %84 : vector<1x128xf32> to vector<32x128xf32>
    %86 = arith.addf %83, %85 : vector<32x128xf32>
    %87 = arith.addf %1, %86 : vector<32x128xf32>
    %cst_18 = arith.constant dense<0.000000e+00> : vector<32xf32>
    %88 = vector.multi_reduction <add>, %87, %cst_18 [1] : vector<32x128xf32> to vector<32xf32>
    %89 = vector.shape_cast %88 : vector<32xf32> to vector<32x1xf32>
    %cst_19 = arith.constant 1.280000e+02 : f32
    %90 = vector.broadcast %cst_19 : f32 to vector<32x1xf32>
    %91 = arith.divf %89, %90 : vector<32x1xf32>
    %92 = vector.broadcast %91 : vector<32x1xf32> to vector<32x128xf32>
    %93 = arith.subf %87, %92 : vector<32x128xf32>
    %94 = arith.mulf %93, %93 : vector<32x128xf32>
    %cst_20 = arith.constant dense<0.000000e+00> : vector<32xf32>
    %95 = vector.multi_reduction <add>, %94, %cst_20 [1] : vector<32x128xf32> to vector<32xf32>
    %96 = vector.shape_cast %95 : vector<32xf32> to vector<32x1xf32>
    %cst_21 = arith.constant 1.280000e+02 : f32
    %97 = vector.broadcast %cst_21 : f32 to vector<32x1xf32>
    %98 = arith.divf %96, %97 : vector<32x1xf32>
    %99 = vector.broadcast %91 : vector<32x1xf32> to vector<32x128xf32>
    %100 = arith.subf %87, %99 : vector<32x128xf32>
    %cst_22 = arith.constant 9.99999974E-6 : f32
    %101 = vector.broadcast %cst_22 : f32 to vector<32x1xf32>
    %102 = arith.addf %98, %101 : vector<32x1xf32>
    %103 = math.rsqrt %102 : vector<32x1xf32>
    %104 = vector.broadcast %103 : vector<32x1xf32> to vector<32x128xf32>
    %105 = arith.mulf %100, %104 : vector<32x128xf32>
    %106 = vector.shape_cast %8 : vector<128xf32> to vector<1x128xf32>
    %107 = vector.broadcast %106 : vector<1x128xf32> to vector<32x128xf32>
    %108 = arith.mulf %105, %107 : vector<32x128xf32>
    %109 = vector.shape_cast %10 : vector<128xf32> to vector<1x128xf32>
    %110 = vector.broadcast %109 : vector<1x128xf32> to vector<32x128xf32>
    %111 = arith.addf %108, %110 : vector<32x128xf32>
    %112 = arith.truncf %111 : vector<32x128xf32> to vector<32x128xbf16>
    %c0_23 = arith.constant 0 : index
    %c0_24 = arith.constant 0 : index
    %113 = vector.load %arg4[%c0_23, %c0_24] : memref<128x512xbf16, #tpu.memory_space<vmem>>, vector<128x512xbf16>
    %cst_25 = arith.constant dense<0.000000e+00> : vector<32x512xf32>
    %114 = tpu.matmul %112, %113, %cst_25 {dimension_numbers = #tpu.dot_dimension_numbers<[1], [0], [0], [1], [0, 0, 1, 1], [], []>} : vector<32x128xbf16>, vector<128x512xbf16>, vector<32x512xf32> -> vector<32x512xf32>
    %c0_26 = arith.constant 0 : index
    %c0_27 = arith.constant 0 : index
    %115 = vector.load %arg7[%c0_26, %c0_27] : memref<1x512xf32, #tpu.memory_space<vmem>>, vector<1x512xf32>
    %116 = vector.broadcast %115 : vector<1x512xf32> to vector<32x512xf32>
    %117 = arith.addf %114, %116 : vector<32x512xf32>
    %cst_28 = arith.constant 0.000000e+00 : f32
    %118 = vector.broadcast %cst_28 : f32 to vector<32x512xf32>
    %119 = arith.maximumf %117, %118 : vector<32x512xf32>
    %120 = arith.truncf %119 : vector<32x512xf32> to vector<32x512xbf16>
    %c0_29 = arith.constant 0 : index
    %c0_30 = arith.constant 0 : index
    %121 = vector.load %arg5[%c0_29, %c0_30] : memref<512x128xbf16, #tpu.memory_space<vmem>>, vector<512x128xbf16>
    %cst_31 = arith.constant dense<0.000000e+00> : vector<32x128xf32>
    %122 = tpu.matmul %120, %121, %cst_31 {dimension_numbers = #tpu.dot_dimension_numbers<[1], [0], [0], [1], [0, 0, 1, 1], [], []>} : vector<32x512xbf16>, vector<512x128xbf16>, vector<32x128xf32> -> vector<32x128xf32>
    %123 = vector.shape_cast %14 : vector<128xf32> to vector<1x128xf32>
    %124 = vector.broadcast %123 : vector<1x128xf32> to vector<32x128xf32>
    %125 = arith.addf %122, %124 : vector<32x128xf32>
    %126 = arith.addf %87, %125 : vector<32x128xf32>
    %127 = vector.shape_cast %126 : vector<32x128xf32> to vector<2x16x128xf32>
    %c0_32 = arith.constant 0 : index
    %c0_33 = arith.constant 0 : index
    %c0_34 = arith.constant 0 : index
    %128 = vector.load %arg8[%c0_32, %c0_33, %c0_34] : memref<2x16x128xf32, #tpu.memory_space<vmem>>, vector<2x16x128xf32>
    tpu.vector_store %arg8[%c0_32, %c0_33, %c0_34], %127 {strides = array<i32>} : memref<2x16x128xf32, #tpu.memory_space<vmem>>, vector<2x16x128xf32>,
    return
  }
  func.func @transform_0(%arg0: i32) -> (i32, i32, i32) {
    %c0_i32 = arith.constant 0 : i32
    %c0_i32_0 = arith.constant 0 : i32
    %c0_i32_1 = arith.constant 0 : i32
    return %arg0, %c0_i32, %c0_i32_0 : i32, i32, i32
  }
  func.func @transform_1(%arg0: i32) -> (i32, i32) {
    %c0_i32 = arith.constant 0 : i32
    %c0_i32_0 = arith.constant 0 : i32
    %c0_i32_1 = arith.constant 0 : i32
    return %c0_i32, %c0_i32_0 : i32, i32
  }
  func.func @transform_2(%arg0: i32) -> (i32, i32) {
    %c0_i32 = arith.constant 0 : i32
    %c0_i32_0 = arith.constant 0 : i32
    %c0_i32_1 = arith.constant 0 : i32
    return %c0_i32, %c0_i32_0 : i32, i32
  }
  func.func @transform_3(%arg0: i32) -> (i32, i32) {
    %c0_i32 = arith.constant 0 : i32
    %c0_i32_0 = arith.constant 0 : i32
    %c0_i32_1 = arith.constant 0 : i32
    return %c0_i32, %c0_i32_0 : i32, i32
  }
  func.func @transform_4(%arg0: i32) -> (i32, i32) {
    %c0_i32 = arith.constant 0 : i32
    %c0_i32_0 = arith.constant 0 : i32
    %c0_i32_1 = arith.constant 0 : i32
    return %c0_i32, %c0_i32_0 : i32, i32
  }
  func.func @transform_5(%arg0: i32) -> (i32, i32) {
    %c0_i32 = arith.constant 0 : i32
    %c0_i32_0 = arith.constant 0 : i32
    %c0_i32_1 = arith.constant 0 : i32
    return %c0_i32, %c0_i32_0 : i32, i32
  }
  func.func @transform_6(%arg0: i32) -> (i32, i32) {
    %c0_i32 = arith.constant 0 : i32
    %c0_i32_0 = arith.constant 0 : i32
    %c0_i32_1 = arith.constant 0 : i32
    return %c0_i32, %c0_i32_0 : i32, i32
  }
  func.func @transform_7(%arg0: i32) -> (i32, i32, i32) {
    %c0_i32 = arith.constant 0 : i32
    %c0_i32_0 = arith.constant 0 : i32
    %c0_i32_1 = arith.constant 0 : i32
    return %arg0, %c0_i32, %c0_i32_0 : i32, i32, i32
  }
}

</mosaic_0001>

<bundles_post_ra>
// kernel: tpu_custom_call.1
= control target key start
LH: loop header
LB: loop body
LE: loop exit
PB: predicated region body
PF: predicated region fallthrough
CT: control target
= control target key end

     0   :  { %12 = vsyncpa [#allocation3], 0  ;;  %s3661_s0 = inlined_call_operand.hbm [shape: f32[2,16,128], index: 0, kind: input, shape index: {}]   ;;  %s3662_s1 = inlined_call_operand.hbm [shape: bf16[128,384], index: 1, kind: input, shape index: {}]   ;;  %s3663_s2 = inlined_call_operand.hbm [shape: bf16[128,128], index: 2, kind: input, shape index: {}]   ;;  %s3664_s3 = inlined_call_operand.hbm [shape: bf16[128,512], index: 3, kind: input, shape index: {}]   ;;  %s3665_s4 = inlined_call_operand.hbm [shape: bf16[512,128], index: 4, kind: input, shape index: {}]   ;;  %s3666_s5 = inlined_call_operand.vmem [shape: f32[8,128], index: 5, kind: input, shape index: {}]   ;;  %s3667_s6 = inlined_call_operand.vmem [shape: f32[1,512], index: 6, kind: input, shape index: {}]   ;;  %s3668_s7 = inlined_call_operand.hbm [shape: f32[2,16,128], index: 7, kind: output, shape index: {}]  }
   0x1   :  { %13 = vsyncpa [#allocation6], 0 }
   0x2   :  { %14 = vsyncpa [#allocation9], 0 }
   0x3   :  { %15 = vsyncpa [#allocation4], 0  ;;  %s3120_s24 = smov [#allocation5]   ;;  %s2980_s28 = scalar_lea.hbm %s3662_s1, 3072 }
   0x4   :  { %s33_s25 = sshll.u32 %s3120_s24, 4  ;;  %p2981_p0 = scmp.ne.s32.totalorder %s3662_s1, %s2980_s28  ;;  %s34_s25 = int_to_ptr.vmem [resolvable:$true] %s33_s25 }
   0x5   :  { %p2984_p1 = scmp.lt.u32.totalorder %s2980_s28, %s3662_s1 }
   0x7   :  { %p2986_p2 = pnand %p2984_p1, %p2981_p0 }
   0x9   :  { %2989 = shalt.err (!%p2986_p2)
}
   0xa   :  { %s2990_s10 = scalar_lea.vmem %s34_s25, 3072  ;;  %p2995_p4 = scmp.lt.s32.totalorder %s34_s25, %s34_s25 }
   0xb   :  { %p2991_p3 = scmp.ne.s32.totalorder %s34_s25, %s2990_s10  ;;  %p2996_p5 = scmp.lt.s32.totalorder %s2990_s10, %s2990_s10 }
   0xd   :  { %p2997_p6 = por %p2996_p5, %p2995_p4 }
   0xf   :  { %p2998_p7 = pnand %p2997_p6, %p2991_p3 }
  0x11   :  { %3001 = shalt.err (!%p2998_p7)
}
  0x12   :  { %s3121_s11 = smov 192   ;;  %s3122_s12 = smov 12  }
  0x13   :  { %39 = dma.hbm_to_vmem [thread:$0]  %s3662_s1, 3072, %s34_s25, [#allocation6], %s3121_s11, %s3121_s11, %s3122_s12  }
  0x14   :  { %s3123_s15 = smov [#allocation8]   ;;  %s3002_s19 = scalar_lea.hbm %s3664_s3, 4096 }
  0x15   :  { %s57_s16 = sshll.u32 %s3123_s15, 4  ;;  %p3003_p8 = scmp.ne.s32.totalorder %s3664_s3, %s3002_s19  ;;  %s58_s16 = int_to_ptr.vmem [resolvable:$true] %s57_s16 }
  0x16   :  { %p3006_p9 = scmp.lt.u32.totalorder %s3002_s19, %s3664_s3 }
  0x18   :  { %p3008_p10 = pnand %p3006_p9, %p3003_p8 }
  0x1a   :  { %3011 = shalt.err (!%p3008_p10)
}
  0x1b   :  { %s3012_s24 = scalar_lea.vmem %s58_s16, 4096  ;;  %p3017_p12 = scmp.lt.s32.totalorder %s58_s16, %s58_s16 }
  0x1c   :  { %p3013_p11 = scmp.ne.s32.totalorder %s58_s16, %s3012_s24  ;;  %p3018_p13 = scmp.lt.s32.totalorder %s3012_s24, %s3012_s24 }
  0x1e   :  { %p3019_p0 = por %p3018_p13, %p3017_p12 }
  0x20   :  { %p3020_p1 = pnand %p3019_p0, %p3013_p11 }
  0x22   :  { %3023 = shalt.err (!%p3020_p1)
}
  0x23   :  { %s3124_s1 = smov 256   ;;  %s3125_s25 = smov 16  }
  0x24   :  { %63 = dma.hbm_to_vmem [thread:$0]  %s3664_s3, 4096, %s58_s16, [#allocation9], %s3124_s1, %s3124_s1, %s3125_s25  }
  0x25   :  { %s3126_s28 = smov [#allocation2]   ;;  %s3024_s9 = scalar_lea.hbm %s3661_s0, 512 }
  0x26   :  { %s21_s29 = sshll.u32 %s3126_s28, 4  ;;  %p3025_p2 = scmp.ne.s32.totalorder %s3661_s0, %s3024_s9  ;;  %s22_s29 = int_to_ptr.vmem [resolvable:$true] %s21_s29 }
  0x27   :  { %p3028_p3 = scmp.lt.u32.totalorder %s3024_s9, %s3661_s0 }
  0x29   :  { %p3030_p4 = pnand %p3028_p3, %p3025_p2 }
  0x2b   :  { %3033 = shalt.err (!%p3030_p4)
}
  0x2c   :  { %s3034_s14 = scalar_lea.vmem %s22_s29, 512  ;;  %p3039_p6 = scmp.lt.s32.totalorder %s22_s29, %s22_s29 }
  0x2d   :  { %p3035_p5 = scmp.ne.s32.totalorder %s22_s29, %s3034_s14  ;;  %p3040_p7 = scmp.lt.s32.totalorder %s3034_s14, %s3034_s14 }
  0x2f   :  { %p3041_p8 = por %p3040_p7, %p3039_p6 }
  0x31   :  { %p3042_p9 = pnand %p3041_p8, %p3035_p5 }
  0x33   :  { %3045 = shalt.err (!%p3042_p9)
}
  0x34   :  { %s3127_s3 = smov 128   ;;  %s3128_s15 = smov 8  }
  0x35   :  { %27 = dma.hbm_to_vmem [thread:$0]  %s3661_s0, 512, %s22_s29, [#allocation3], %s3127_s3, %s3127_s3, %s3128_s15  }
  0x36   :  { %s3129_s18 = smov [#allocation7]   ;;  %s3046_s22 = scalar_lea.hbm %s3663_s2, 1024 }
  0x37   :  { %s45_s19 = sshll.u32 %s3129_s18, 4  ;;  %p3047_p10 = scmp.ne.s32.totalorder %s3663_s2, %s3046_s22  ;;  %s46_s19 = int_to_ptr.vmem [resolvable:$true] %s45_s19 }
  0x38   :  { %p3050_p11 = scmp.lt.u32.totalorder %s3046_s22, %s3663_s2 }
  0x3a   :  { %p3052_p12 = pnand %p3050_p11, %p3047_p10 }
  0x3c   :  { %3055 = shalt.err (!%p3052_p12)
}
  0x3d   :  { %s3056_s26 = scalar_lea.vmem %s46_s19, 1024  ;;  %p3061_p0 = scmp.lt.s32.totalorder %s46_s19, %s46_s19 }
  0x3e   :  { %p3057_p13 = scmp.ne.s32.totalorder %s46_s19, %s3056_s26  ;;  %p3062_p1 = scmp.lt.s32.totalorder %s3056_s26, %s3056_s26 }
  0x40   :  { %p3063_p2 = por %p3062_p1, %p3061_p0 }
  0x42   :  { %p3064_p3 = pnand %p3063_p2, %p3057_p13 }
  0x44   :  { %3067 = shalt.err (!%p3064_p3)
}
  0x45   :  { %s3130_s0 = smov 64   ;;  %s3131_s27 = smov 4  }
  0x46   :  { %51 = dma.hbm_to_vmem [thread:$0]  %s3663_s2, 1024, %s46_s19, [#allocation6], %s3130_s0, %s3130_s0, %s3131_s27  }
  0x47   :  { %s3132_s30 = smov [#allocation10]   ;;  %s3068_s11 = scalar_lea.hbm %s3665_s4, 4096 }
  0x48   :  { %s69_s8 = sshll.u32 %s3132_s30, 4  ;;  %p3069_p4 = scmp.ne.s32.totalorder %s3665_s4, %s3068_s11  ;;  %s70_s8 = int_to_ptr.vmem [resolvable:$true] %s69_s8 }
  0x49   :  { %p3072_p5 = scmp.lt.u32.totalorder %s3068_s11, %s3665_s4 }
  0x4b   :  { %p3074_p6 = pnand %p3072_p5, %p3069_p4 }
  0x4d   :  { %3077 = shalt.err (!%p3074_p6)
}
  0x4e   :  { %s3078_s17 = scalar_lea.vmem %s70_s8, 4096  ;;  %p3083_p8 = scmp.lt.s32.totalorder %s70_s8, %s70_s8 }
  0x4f   :  { %p3079_p7 = scmp.ne.s32.totalorder %s70_s8, %s3078_s17  ;;  %p3084_p9 = scmp.lt.s32.totalorder %s3078_s17, %s3078_s17 }
  0x51   :  { %p3085_p10 = por %p3084_p9, %p3083_p8 }
  0x53   :  { %p3086_p11 = pnand %p3085_p10, %p3079_p7 }
  0x55   :  { %3089 = shalt.err (!%p3086_p11)
}
  0x56   :  { %75 = dma.hbm_to_vmem [thread:$0]  %s3665_s4, 4096, %s70_s8, [#allocation9], %s3130_s0, %s3130_s0, %s3131_s27  }
  0x57   :  { %3112 = dma.done.wait [#allocation3], 512  }
  0x58   :  { %3113 = vsyncadd [#allocation3], 4294966784 }
  0x59   :  { %3114 = dma.done.wait [#allocation6], 4096  }
  0x5a   :  { %3115 = vsyncadd [#allocation6], 4294963200 }
  0x5b   :  { %3116 = dma.done.wait [#allocation9], 8192  }
  0x5c   :  { %3117 = vsyncadd [#allocation9], 4294959104  ;;  %v96_v0 = vld [vmem:[#allocation2] sm:$0xff]  ;;  %v98_v1 = vld [vmem:[#allocation2 + $0x10] sm:$0xff]  ;;  %v3133_v39 = vmov 0   ;;  %v146_v50 = vlaneseq  ;;  %vm3135_vm0 = vmmov 0  }
  0x5d   :  { %v97_v2 = vld [vmem:[#allocation2 + $0x8] sm:$0xff]  ;;  %101 = vadd.xlane.f32.xlu0 %v96_v0  ;;  %105 = vadd.xlane.f32.xlu1 %v98_v1  ;;  %v99_v3 = vld [vmem:[#allocation2 + $0x18] sm:$0xff]  ;;  %v2775_v4 = vld [vmem:[#allocation5 + $0x4] ss:$12 sps:$4 sm:$0xff]   ;;  %vm480_vm1 = vcmask 261120   ;;  %s3136_s20 = smov 96  }
  0x5e   :  { %v2777_v5 = vld [vmem:[#allocation5] ss:$12 sps:$4 sm:$0xff]   ;;  %v2778_v6 = vld [vmem:[#allocation5 + $0x1c] ss:$12 sps:$4 sm:$0xff]   ;;  %324 = vmatprep.subr.bf16.mxu0 %v2775_v4  ;;  %v2781_v24 = vld [vmem:[#allocation5 + $0x18] ss:$12 sps:$4 sm:$0xff]   ;;  %356 = vmatprep.mubr.bf16.mxu0 %v3133_v39 }
  0x5f   :  { %v2780_v7 = vld [vmem:[#allocation5 + $0x8] ss:$12 sps:$4 sm:$0xff]   ;;  %325 = vmatpush1.bf16.msra.mxu0 %v2777_v5  ;;  %v2784_v26 = vld [vmem:[#allocation5 + $0x20] ss:$12 sps:$4 sm:$0xff]   ;;  %v2785_v27 = vld [vmem:[#allocation5 + $0x30] ss:$12 sps:$4 sm:$0xff]  }
  0x60   :  { %2590 = vmatprep.subr.bf16.mxu1 %v2780_v7  ;;  %326 = vmatprep.subr.bf16.mxu0 %v2778_v6  ;;  %v2782_v25 = vld [vmem:[#allocation5 + $0x34] ss:$12 sps:$4 sm:$0xff]   ;;  %v2786_v28 = vld [vmem:[#allocation5 + $0x4c] ss:$12 sps:$4 sm:$0xff]   ;;  %v2790_v31 = vld [vmem:[#allocation5 + $0x64] ss:$12 sps:$4 sm:$0xff]  }
  0x61   :  { %103 = vadd.xlane.f32.xlu0 %v97_v2  ;;  %107 = vadd.xlane.f32.xlu1 %v99_v3  ;;  %v2788_v29 = vld [vmem:[#allocation5 + $0x38] ss:$12 sps:$4 sm:$0xff]   ;;  %v2789_v30 = vld [vmem:[#allocation5 + $0x48] ss:$12 sps:$4 sm:$0xff]   ;;  %v2792_v32 = vld [vmem:[#allocation5 + $0x50] ss:$12 sps:$4 sm:$0xff]  }
  0x62   :  { %2591 = vmatpush3.bf16.msra.mxu1 %v2780_v7  ;;  %v2793_v33 = vld [vmem:[#allocation5 + $0x60] ss:$12 sps:$4 sm:$0xff]   ;;  %v2794_v34 = vld [vmem:[#allocation5 + $0x7c] ss:$12 sps:$4 sm:$0xff]   ;;  %v2797_v36 = vld [vmem:[#allocation5 + $0x78] ss:$12 sps:$4 sm:$0xff]  }
  0x63   :  { %327 = vmatpush1.bf16.msra.mxu0 %v2781_v24  ;;  %2592 = vmatprep.subr.bf16.mxu1 %v2784_v26  ;;  %v2796_v35 = vld [vmem:[#allocation5 + $0x68] ss:$12 sps:$4 sm:$0xff]   ;;  %v2800_v38 = vld [vmem:[#allocation5 + $0x80] ss:$12 sps:$4 sm:$0xff]   ;;  %v2801_v40 = vld [vmem:[#allocation5 + $0x90] ss:$12 sps:$4 sm:$0xff]  }
  0x64   :  { %328 = vmatprep.subr.bf16.mxu0 %v2782_v25  ;;  %v2798_v37 = vld [vmem:[#allocation5 + $0x94] ss:$12 sps:$4 sm:$0xff]   ;;  %v2802_v41 = vld [vmem:[#allocation5 + $0xac] ss:$12 sps:$4 sm:$0xff]   ;;  %v2806_v44 = vld [vmem:[#allocation5 + $0xb0] ss:$12 sps:$4 sm:$0xff]  }
  0x65   :  { %v2804_v42 = vld [vmem:[#allocation5 + $0x98] ss:$12 sps:$4 sm:$0xff]   ;;  %v2805_v43 = vld [vmem:[#allocation5 + $0xa8] ss:$12 sps:$4 sm:$0xff]   ;;  %v3263_v56 = vshrl.u32 %v146_v50, 7  ;;  %s3137_s21 = smov 32  }
  0x66   :  { %2593 = vmatpush3.bf16.msra.mxu1 %v2784_v26  ;;  %v100_v60 = vld [vmem:[%s3666_s5] sm:$0xff]  ;;  %vm857_vm2 = vcmask 130048   ;;  %vm1446_vm3 = vcmask 523264   ;;  %vm1451_vm4 = vcmask 785408  }
  0x67   :  { %329 = vmatpush1.bf16.msra.mxu0 %v2785_v27  ;;  %2594 = vmatprep.subr.bf16.mxu1 %v2788_v29  ;;  %v148_v59 = vsub.s32 0, %v3263_v56 }
  0x68   :  { %330 = vmatprep.subr.bf16.mxu0 %v2786_v28 }
  0x69   :  { %v149_v63 = vrot.slane %v100_v60, %v148_v59 }
  0x6a   :  { %2595 = vmatpush3.bf16.msra.mxu1 %v2788_v29 }
  0x6b   :  { %331 = vmatpush1.bf16.msra.mxu0 %v2789_v30  ;;  %2596 = vmatprep.subr.bf16.mxu1 %v2792_v32 }
  0x6c   :  { %332 = vmatprep.subr.bf16.mxu0 %v2790_v31 }
  0x6e   :  { %2597 = vmatpush3.bf16.msra.mxu1 %v2792_v32 }
  0x6f   :  { %333 = vmatpush1.bf16.msra.mxu0 %v2793_v33  ;;  %2598 = vmatprep.subr.bf16.mxu1 %v2796_v35 }
  0x70   :  { %334 = vmatprep.subr.bf16.mxu0 %v2794_v34 }
  0x72   :  { %2599 = vmatpush3.bf16.msra.mxu1 %v2796_v35 }
  0x73   :  { %335 = vmatpush1.bf16.msra.mxu0 %v2797_v36  ;;  %2600 = vmatprep.subr.bf16.mxu1 %v2800_v38 }
  0x74   :  { %336 = vmatprep.subr.bf16.mxu0 %v2798_v37 }
  0x76   :  { %2601 = vmatpush3.bf16.msra.mxu1 %v2800_v38 }
  0x77   :  { %337 = vmatpush1.bf16.msra.mxu0 %v2801_v40  ;;  %2602 = vmatprep.subr.bf16.mxu1 %v2804_v42 }
  0x78   :  { %338 = vmatprep.subr.bf16.mxu0 %v2802_v41 }
  0x7a   :  { %2603 = vmatpush3.bf16.msra.mxu1 %v2804_v42 }
  0x7b   :  { %339 = vmatpush1.bf16.msra.mxu0 %v2805_v43  ;;  %2604 = vmatprep.subr.bf16.mxu1 %v2806_v44 }
  0x7e   :  { %2605 = vmatpush3.bf16.msra.mxu1 %v2806_v44 }
  0xea   :  { %v102_v8 = vpop.xlane.xlu0 %101  ;;  %v106_v9 = vpop.xlane.xlu1 %105 }
  0xeb   :  { %v110_v10 = vmul.f32 0.0078125, %v102_v8  ;;  %v112_v11 = vmul.f32 0.0078125, %v106_v9 }
  0xed   :  { %v3246_v12 = vsub.f32 %v96_v0, %v110_v10  ;;  %v3248_v13 = vsub.f32 %v98_v1, %v112_v11  ;;  %v156_v0 = vsub.s32 1, %v3263_v56 }
  0xee   :  { %v104_v14 = vpop.xlane.xlu0 %103  ;;  %v108_v15 = vpop.xlane.xlu1 %107 }
  0xef   :  { %v111_v16 = vmul.f32 0.0078125, %v104_v14  ;;  %v118_v17 = vmul.f32 %v3246_v12, %v3246_v12  ;;  %v113_v18 = vmul.f32 0.0078125, %v108_v15  ;;  %v120_v21 = vmul.f32 %v3248_v13, %v3248_v13 }
  0xf0   :  { %v157_v5 = vrot.slane %v100_v60, %v156_v0 }
  0xf1   :  { %v3252_v19 = vsub.f32 %v97_v2, %v111_v16  ;;  %122 = vadd.xlane.f32.xlu0 %v118_v17  ;;  %v3254_v20 = vsub.f32 %v99_v3, %v113_v18 }
  0xf3   :  { %v119_v22 = vmul.f32 %v3252_v19, %v3252_v19  ;;  %v121_v23 = vmul.f32 %v3254_v20, %v3254_v20 }
  0xf5   :  { %126 = vadd.xlane.f32.xlu0 %v120_v21  ;;  %124 = vadd.xlane.f32.xlu1 %v119_v22 }
  0xf9   :  { %128 = vadd.xlane.f32.xlu1 %v121_v23 }
 0x17e   :  { %v123_v45 = vpop.xlane.xlu0 %122 }
 0x17f   :  { %v130_v46 = vmul.f32 0.0078125, %v123_v45 }
 0x181   :  { %v134_v47 = vadd.f32 1e-05, %v130_v46 }
 0x182   :  { %v125_v48 = vpop.xlane.xlu1 %124  ;;  %v127_v49 = vpop.xlane.xlu0 %126 }
 0x183   :  { %2895 = vrsqrt.f32 %v134_v47  ;;  %v131_v51 = vmul.f32 0.0078125, %v125_v48  ;;  %v132_v52 = vmul.f32 0.0078125, %v127_v49 }
 0x185   :  { %v135_v53 = vadd.f32 1e-05, %v131_v51  ;;  %v136_v54 = vadd.f32 1e-05, %v132_v52 }
 0x186   :  { %v129_v55 = vpop.xlane.xlu1 %128 }
 0x187   :  { %2897 = vrsqrt.f32 %v135_v53  ;;  %v133_v57 = vmul.f32 0.0078125, %v129_v55 }
 0x188   :  { %2899 = vrsqrt.f32 %v136_v54 }
 0x189   :  { %v137_v58 = vadd.f32 1e-05, %v133_v57 }
 0x18b   :  { %2901 = vrsqrt.f32 %v137_v58 }
 0x18d   :  { %v2896_v61 = vpop.eup %2895 }
 0x18e   :  { %v142_v62 = vmul.f32 %v2896_v61, %v3246_v12 }
 0x190   :  { %v150_v4 = vmul.f32 %v149_v63, %v142_v62 }
 0x191   :  { %v2898_v1 = vpop.eup %2897 }
 0x192   :  { %v2900_v2 = vpop.eup %2899  ;;  %v143_v3 = vmul.f32 %v2898_v1, %v3252_v19  ;;  %v158_v9 = vadd.f32 %v157_v5, %v150_v4  ;;  %v3134_v19 = vmov 0.0  }
 0x193   :  { %v144_v6 = vmul.f32 %v2900_v2, %v3248_v13  ;;  %2610 = vmatprep.subr.bf16.mxu0 %v3134_v19  ;;  %2622 = vmatprep.subr.bf16.mxu1 %v3134_v19 }
 0x194   :  { %v151_v7 = vmul.f32 %v149_v63, %v143_v3 }
 0x195   :  { %v2902_v8 = vpop.eup %2901  ;;  %v152_v12 = vmul.f32 %v149_v63, %v144_v6 }
 0x196   :  { %v159_v10 = vadd.f32 %v157_v5, %v151_v7  ;;  %v145_v11 = vmul.f32 %v2902_v8, %v3254_v20 }
 0x197   :  { %v160_v16 = vadd.f32 %v157_v5, %v152_v12 }
 0x198   :  { %v162_v14 = vpack.c.bf16 %v159_v10, %v158_v9  ;;  %v153_v15 = vmul.f32 %v149_v63, %v145_v11 }
 0x19a   :  { %357 = vmatmul.mubr.bf16.vlgmr.msra.gmra.mrb[0].mxu0 %v162_v14  ;;  %2606 = vmatprep.mubr.bf16.mxu1 %v162_v14  ;;  %v161_v17 = vadd.f32 %v157_v5, %v153_v15 }
 0x19b   :  { %366 = vmatprep.mubr.bf16.mxu0 %v3133_v39 }
 0x19c   :  { %v163_v18 = vpack.c.bf16 %v161_v17, %v160_v16 }
 0x19e   :  { %2607 = vmatmul.mubr.bf16.vlgmr.msra.gmra.mrb[0].mxu1 %v163_v18 }
 0x19f   :  { %2624 = vmatprep.mubr.msk.bf16.mxu1 %vm3135_vm0, %v3134_v19 }
 0x1a2   :  { %367 = vmatmul.mubr.bf16.gmra.mrb[4].mxu0 %v163_v18 }
 0x1a3   :  { %2612 = vmatprep.mubr.msk.bf16.mxu0 %vm3135_vm0, %v3134_v19 }
 0x26d   :  { %v358_v13 = vpop.f32.mrb[0].mxu0 }
 0x26e   :  { %v360_v20 = vpop.f32.mrb[1].mxu0 }
 0x26f   :  { %v362_v21 = vpop.f32.mrb[2].mxu0 }
 0x270   :  { %v426_v22 = vpack.c.bf16 %v362_v21, %v358_v13  ;;  %v364_v23 = vpop.f32.mrb[3].mxu0 }
 0x271   :  { %v427_v24 = vpack.c.bf16 %v364_v23, %v360_v20  ;;  %v2608_v25 = vpop.f32.mrb[0].mxu1 }
 0x272   :  { %434 = vrot.lane.b32.xlu1 %v426_v22, %s3136_s20  ;;  %v411_v26 = vpop.f32.mrb[1].mxu1 }
 0x273   :  { %448 = vrot.lane.b32.xlu0 %v427_v24, %s3136_s20  ;;  %v2609_v27 = vpop.f32.mrb[2].mxu1  ;;  %v485_v28 = vsel %vm480_vm1, %v427_v24, 0 }
 0x274   :  { %v3288_v29 = vpack.c.bf16 %v2609_v27, %v2608_v25  ;;  %v414_v30 = vpop.f32.mrb[3].mxu1  ;;  %2611 = vmatpush3.bf16.xpose.msra.mxu0 %v485_v28 }
 0x275   :  { %v3290_v31 = vpack.c.bf16 %v414_v30, %v411_v26  ;;  %v368_v32 = vpop.f32.mrb[4].mxu0  ;;  %2616 = vmatprep.subr.bf16.mxu0 %v3134_v19 }
 0x276   :  { %v370_v33 = vpop.f32.mrb[5].mxu0 }
 0x277   :  { %v372_v34 = vpop.f32.mrb[6].mxu0 }
 0x278   :  { %v429_v35 = vpack.c.bf16 %v372_v34, %v368_v32  ;;  %v374_v36 = vpop.f32.mrb[7].mxu0 }
 0x279   :  { %v430_v37 = vpack.c.bf16 %v374_v36, %v370_v33 }
 0x27a   :  { %436 = vrot.lane.b32.xlu0 %v429_v35, %s3136_s20 }
 0x27b   :  { %2613 = vmatmul.mubr.msk.bf16.vlgmr.msra.gmra.mrb[8].mxu0 %vm480_vm1, %v426_v22  ;;  %450 = vrot.lane.b32.xlu1 %v430_v37, %s3136_s20  ;;  %v532_v38 = vsel %vm480_vm1, %v430_v37, 0 }
 0x27c   :  { %2617 = vmatpush3.bf16.xpose.msra.mxu0 %v532_v38  ;;  %2618 = vmatprep.mubr.msk.bf16.mxu0 %vm3135_vm0, %v3134_v19 }
 0x27d   :  { %2628 = vmatprep.subr.bf16.mxu0 %v3134_v19 }
 0x27e   :  { %438 = vrot.lane.b32.xlu0 %v426_v22, %s3130_s0 }
 0x27f   :  { %452 = vrot.lane.b32.xlu1 %v427_v24, %s3130_s0 }
 0x282   :  { %440 = vrot.lane.b32.xlu0 %v429_v35, %s3130_s0 }
 0x283   :  { %454 = vrot.lane.b32.xlu1 %v430_v37, %s3130_s0  ;;  %2619 = vmatmul.mubr.msk.bf16.vlgmr.msra.gmra.mrb[12].mxu0 %vm480_vm1, %v429_v35 }
 0x284   :  { %2630 = vmatprep.mubr.msk.bf16.mxu0 %vm3135_vm0, %v3134_v19 }
 0x286   :  { %442 = vrot.lane.b32.xlu0 %v426_v22, %s3137_s21 }
 0x287   :  { %456 = vrot.lane.b32.xlu1 %v427_v24, %s3137_s21 }
 0x28b   :  { %458 = vrot.lane.b32.xlu1 %v430_v37, %s3137_s21 }
 0x28f   :  { %444 = vrot.lane.b32.xlu1 %v429_v35, %s3137_s21 }
 0x2e4   :  { %v435_v42 = vpop.permute.xlu1 %434 }
 0x2e5   :  { %v449_v40 = vpop.permute.xlu0 %448 }
 0x2e6   :  { %v579_v41 = vsel %vm480_vm1, %v449_v40, 0 }
 0x2e7   :  { %2623 = vmatpush3.bf16.xpose.msra.mxu1 %v579_v41 }
 0x2e8   :  { %2634 = vmatprep.subr.bf16.mxu1 %v3134_v19 }
 0x2ec   :  { %v437_v45 = vpop.permute.xlu0 %436 }
 0x2ed   :  { %v451_v43 = vpop.permute.xlu1 %450 }
 0x2ee   :  { %v626_v44 = vsel %vm480_vm1, %v451_v43, 0  ;;  %2625 = vmatmul.mubr.msk.bf16.vlgmr.msra.gmra.mrb[4].mxu1 %vm480_vm1, %v435_v42 }
 0x2ef   :  { %2629 = vmatpush3.bf16.xpose.msra.mxu0 %v626_v44  ;;  %2636 = vmatprep.mubr.msk.bf16.mxu1 %vm3135_vm0, %v3134_v19 }
 0x2f0   :  { %2640 = vmatprep.subr.bf16.mxu0 %v3134_v19  ;;  %v439_v48 = vpop.permute.xlu0 %438 }
 0x2f1   :  { %v453_v46 = vpop.permute.xlu1 %452 }
 0x2f2   :  { %v673_v47 = vsel %vm480_vm1, %v453_v46, 0 }
 0x2f3   :  { %2635 = vmatpush3.bf16.xpose.msra.mxu1 %v673_v47 }
 0x2f4   :  { %2646 = vmatprep.subr.bf16.mxu1 %v3134_v19  ;;  %v441_v53 = vpop.permute.xlu0 %440 }
 0x2f5   :  { %v455_v49 = vpop.permute.xlu1 %454 }
 0x2f6   :  { %v720_v50 = vsel %vm480_vm1, %v455_v49, 0  ;;  %2631 = vmatmul.mubr.msk.bf16.vlgmr.msra.gmra.mrb[16].mxu0 %vm480_vm1, %v437_v45 }
 0x2f7   :  { %2641 = vmatpush3.bf16.xpose.msra.mxu0 %v720_v50  ;;  %2642 = vmatprep.mubr.msk.bf16.mxu0 %vm3135_vm0, %v3134_v19 }
 0x2f8   :  { %2652 = vmatprep.subr.bf16.mxu0 %v3134_v19  ;;  %v443_v57 = vpop.permute.xlu0 %442 }
 0x2f9   :  { %v457_v51 = vpop.permute.xlu1 %456 }
 0x2fa   :  { %v767_v52 = vsel %vm480_vm1, %v457_v51, 0  ;;  %2637 = vmatmul.mubr.msk.bf16.vlgmr.msra.gmra.mrb[8].mxu1 %vm480_vm1, %v439_v48 }
 0x2fb   :  { %2647 = vmatpush3.bf16.xpose.msra.mxu1 %v767_v52  ;;  %2648 = vmatprep.mubr.msk.bf16.mxu1 %vm3135_vm0, %v3134_v19 }
 0x2fc   :  { %2658 = vmatprep.subr.bf16.mxu1 %v3134_v19 }
 0x2fd   :  { %v459_v54 = vpop.permute.xlu1 %458 }
 0x2fe   :  { %v814_v55 = vsel %vm480_vm1, %v459_v54, 0  ;;  %2643 = vmatmul.mubr.msk.bf16.vlgmr.msra.gmra.mrb[20].mxu0 %vm480_vm1, %v441_v53 }
 0x2ff   :  { %2653 = vmatpush3.bf16.xpose.msra.mxu0 %v814_v55  ;;  %2654 = vmatprep.mubr.msk.bf16.mxu0 %vm3135_vm0, %v3134_v19 }
 0x300   :  { %2664 = vmatprep.subr.bf16.mxu0 %v3134_v19 }
 0x301   :  { %v445_v58 = vpop.permute.xlu1 %444 }
 0x302   :  { %2649 = vmatmul.mubr.msk.bf16.vlgmr.msra.gmra.mrb[12].mxu1 %vm480_vm1, %v443_v57 }
 0x303   :  { %2659 = vmatpush3.bf16.msra.mxu1 %v3290_v31  ;;  %2660 = vmatprep.mubr.msk.bf16.mxu1 %vm3135_vm0, %v3134_v19 }
 0x304   :  { %2670 = vmatprep.subr.bf16.mxu1 %v3134_v19 }
 0x306   :  { %2655 = vmatmul.mubr.msk.bf16.vlgmr.msra.gmra.mrb[24].mxu0 %vm480_vm1, %v445_v58 }
 0x307   :  { %2665 = vmatpush3.bf16.msra.mxu0 %v3288_v29  ;;  %2666 = vmatprep.mubr.msk.bf16.mxu0 %vm3135_vm0, %v3134_v19 }
 0x308   :  { %2676 = vmatprep.subr.bf16.mxu0 %v3134_v19 }
 0x34e   :  { %v3345_v60 = vpop.f32.mrb[8].mxu0 }
 0x34f   :  { %v2614_v61 = vpop.f32.mrb[9].mxu0  ;;  %v858_v62 = vsel %vm857_vm2, %v3345_v60, -inf }
 0x350   :  { %859 = vmax.xlane.f32.xlu0 %v858_v62  ;;  %v3349_v63 = vpop.f32.mrb[10].mxu0 }
 0x351   :  { %v2615_v1 = vpop.f32.mrb[11].mxu0  ;;  %v861_v2 = vsel %vm857_vm2, %v3349_v63, -inf }
 0x352   :  { %862 = vmax.xlane.f32.xlu1 %v861_v2 }
 0x356   :  { %v3353_v3 = vpop.f32.mrb[12].mxu0 }
 0x357   :  { %v2620_v4 = vpop.f32.mrb[13].mxu0  ;;  %v864_v5 = vsel %vm857_vm2, %v3353_v3, -inf }
 0x358   :  { %865 = vmax.xlane.f32.xlu0 %v864_v5  ;;  %v3357_v6 = vpop.f32.mrb[14].mxu0 }
 0x359   :  { %v2621_v7 = vpop.f32.mrb[15].mxu0  ;;  %v867_v8 = vsel %vm857_vm2, %v3357_v6, -inf }
 0x35c   :  { %868 = vmax.xlane.f32.xlu0 %v867_v8 }
 0x3c1   :  { %v3361_v9 = vpop.f32.mrb[4].mxu1 }
 0x3c2   :  { %v2626_v10 = vpop.f32.mrb[5].mxu1  ;;  %v870_v11 = vsel %vm857_vm2, %v3361_v9, -inf }
 0x3c3   :  { %871 = vmax.xlane.f32.xlu0 %v870_v11  ;;  %v3365_v12 = vpop.f32.mrb[6].mxu1 }
 0x3c4   :  { %v2627_v14 = vpop.f32.mrb[7].mxu1  ;;  %v873_v15 = vsel %vm857_vm2, %v3365_v12, -inf }
 0x3c5   :  { %874 = vmax.xlane.f32.xlu1 %v873_v15 }
 0x3c9   :  { %v3369_v16 = vpop.f32.mrb[16].mxu0 }
 0x3ca   :  { %v2632_v17 = vpop.f32.mrb[17].mxu0  ;;  %v876_v18 = vsel %vm857_vm2, %v3369_v16, -inf }
 0x3cb   :  { %877 = vmax.xlane.f32.xlu0 %v876_v18  ;;  %v3373_v13 = vpop.f32.mrb[18].mxu0 }
 0x3cc   :  { %v2633_v20 = vpop.f32.mrb[19].mxu0  ;;  %v879_v21 = vsel %vm857_vm2, %v3373_v13, -inf }
 0x3cd   :  { %880 = vmax.xlane.f32.xlu1 %v879_v21  ;;  %v3377_v22 = vpop.f32.mrb[8].mxu1 }
 0x3ce   :  { %v2638_v23 = vpop.f32.mrb[9].mxu1  ;;  %v882_v24 = vsel %vm857_vm2, %v3377_v22, -inf }
 0x3cf   :  { %883 = vmax.xlane.f32.xlu0 %v882_v24  ;;  %v3381_v25 = vpop.f32.mrb[10].mxu1 }
 0x3d0   :  { %v2639_v26 = vpop.f32.mrb[11].mxu1  ;;  %v885_v27 = vsel %vm857_vm2, %v3381_v25, -inf }
 0x3d1   :  { %886 = vmax.xlane.f32.xlu1 %v885_v27  ;;  %v3385_v28 = vpop.f32.mrb[20].mxu0 }
 0x3d2   :  { %v2644_v30 = vpop.f32.mrb[21].mxu0  ;;  %v888_v32 = vsel %vm857_vm2, %v3385_v28, -inf }
 0x3d3   :  { %889 = vmax.xlane.f32.xlu0 %v888_v32  ;;  %v3389_v33 = vpop.f32.mrb[22].mxu0 }
 0x3d4   :  { %v2645_v34 = vpop.f32.mrb[23].mxu0  ;;  %v891_v35 = vsel %vm857_vm2, %v3389_v33, -inf }
 0x3d5   :  { %892 = vmax.xlane.f32.xlu1 %v891_v35  ;;  %v3393_v36 = vpop.f32.mrb[12].mxu1 }
 0x3d6   :  { %v2650_v37 = vpop.f32.mrb[13].mxu1  ;;  %v894_v38 = vsel %vm857_vm2, %v3393_v36, -inf }
 0x3d7   :  { %895 = vmax.xlane.f32.xlu0 %v894_v38  ;;  %v3397_v40 = vpop.f32.mrb[14].mxu1 }
 0x3d8   :  { %v2651_v41 = vpop.f32.mrb[15].mxu1  ;;  %v897_v42 = vsel %vm857_vm2, %v3397_v40, -inf }
 0x3d9   :  { %v3401_v43 = vpop.f32.mrb[24].mxu0  ;;  %898 = vmax.xlane.f32.xlu1 %v897_v42 }
 0x3da   :  { %v2656_v44 = vpop.f32.mrb[25].mxu0  ;;  %v900_v45 = vsel %vm857_vm2, %v3401_v43, -inf }
 0x3db   :  { %v3405_v46 = vpop.f32.mrb[26].mxu0  ;;  %901 = vmax.xlane.f32.xlu0 %v900_v45 }
 0x3dc   :  { %v2657_v47 = vpop.f32.mrb[27].mxu0  ;;  %v903_v58 = vsel %vm857_vm2, %v3405_v46, -inf }
 0x3dd   :  { %v860_v48 = vpop.xlane.xlu0 %859 }
 0x3de   :  { %v906_v49 = vsub.f32 %v3345_v60, %v860_v48 }
 0x3df   :  { %v863_v61 = vpop.xlane.xlu1 %862 }
 0x3e0   :  { %v922_v51 = vmul.f32 1.442695, %v906_v49  ;;  %v907_v62 = vsub.f32 %v3349_v63, %v863_v61 }
 0x3e2   :  { %2903 = vpow2.f32 %v922_v51  ;;  %v924_v2 = vmul.f32 1.442695, %v907_v62 }
 0x3e5   :  { %v866_v50 = vpop.xlane.xlu0 %865 }
 0x3e6   :  { %v908_v52 = vsub.f32 %v3353_v3, %v866_v50 }
 0x3e8   :  { %v926_v53 = vmul.f32 1.442695, %v908_v52 }
 0x3e9   :  { %v869_v1 = vpop.xlane.xlu0 %868 }
 0x3ea   :  { %464 = vrot.lane.b32.xlu1 %v3288_v29, %s3136_s20  ;;  %2905 = vpow2.f32 %v926_v53  ;;  %v909_v3 = vsub.f32 %v3357_v6, %v869_v1 }
 0x3eb   :  { %2907 = vpow2.f32 %v924_v2 }
 0x3ec   :  { %v3415_v54 = vpop.eup %2903  ;;  %v928_v4 = vmul.f32 1.442695, %v909_v3 }
 0x3ed   :  { %v954_v55 = vsel %vm857_vm2, %v3415_v54, 0.0 }
 0x3ee   :  { %468 = vrot.lane.b32.xlu1 %v3290_v31, %s3130_s0  ;;  %2909 = vpow2.f32 %v928_v4 }
 0x3f1   :  { %462 = vrot.lane.b32.xlu0 %v3290_v31, %s3136_s20 }
 0x3f4   :  { %v3419_v57 = vpop.eup %2905 }
 0x3f5   :  { %v960_v60 = vsel %vm857_vm2, %v3419_v57, 0.0  ;;  %v3429_v5 = vpop.eup %2907 }
 0x3f6   :  { %v957_v7 = vsel %vm857_vm2, %v3429_v5, 0.0 }
 0x3f8   :  { %v3433_v8 = vpop.eup %2909 }
 0x3f9   :  { %v963_v10 = vsel %vm857_vm2, %v3433_v8, 0.0 }
 0x410   :  { %955 = vadd.xlane.f32.xlu0 %v954_v55 }
 0x412   :  { %904 = vmax.xlane.f32.xlu1 %v903_v58 }
 0x414   :  { %961 = vadd.xlane.f32.xlu0 %v960_v60 }
 0x423   :  { %470 = vrot.lane.b32.xlu1 %v3288_v29, %s3130_s0 }
 0x447   :  { %958 = vadd.xlane.f32.xlu1 %v957_v7 }
 0x44b   :  { %964 = vadd.xlane.f32.xlu1 %v963_v10 }
 0x450   :  { %v872_v63 = vpop.xlane.xlu0 %871 }
 0x451   :  { %v910_v11 = vsub.f32 %v3361_v9, %v872_v63 }
 0x452   :  { %v875_v14 = vpop.xlane.xlu1 %874 }
 0x453   :  { %v930_v6 = vmul.f32 1.442695, %v910_v11  ;;  %v911_v15 = vsub.f32 %v3365_v12, %v875_v14 }
 0x455   :  { %2911 = vpow2.f32 %v930_v6  ;;  %v932_v17 = vmul.f32 1.442695, %v911_v15 }
 0x457   :  { %2913 = vpow2.f32 %v932_v17 }
 0x458   :  { %v878_v18 = vpop.xlane.xlu0 %877 }
 0x459   :  { %v912_v20 = vsub.f32 %v3369_v16, %v878_v18 }
 0x45a   :  { %v881_v21 = vpop.xlane.xlu1 %880 }
 0x45b   :  { %v934_v23 = vmul.f32 1.442695, %v912_v20  ;;  %v913_v24 = vsub.f32 %v3373_v13, %v881_v21 }
 0x45c   :  { %v884_v26 = vpop.xlane.xlu0 %883 }
 0x45d   :  { %2915 = vpow2.f32 %v934_v23  ;;  %v936_v27 = vmul.f32 1.442695, %v913_v24  ;;  %v914_v30 = vsub.f32 %v3377_v22, %v884_v26 }
 0x45e   :  { %v887_v9 = vpop.xlane.xlu1 %886 }
 0x45f   :  { %v3442_v32 = vpop.eup %2911  ;;  %2917 = vpow2.f32 %v936_v27  ;;  %v938_v12 = vmul.f32 1.442695, %v914_v30  ;;  %v915_v34 = vsub.f32 %v3381_v25, %v887_v9 }
 0x460   :  { %v890_v35 = vpop.xlane.xlu0 %889  ;;  %v966_v16 = vsel %vm857_vm2, %v3442_v32, 0.0 }
 0x461   :  { %v3447_v37 = vpop.eup %2913  ;;  %2919 = vpow2.f32 %v938_v12  ;;  %v940_v13 = vmul.f32 1.442695, %v915_v34  ;;  %v916_v38 = vsub.f32 %v3385_v28, %v890_v35  ;;  %967 = vadd.xlane.f32.xlu0 %v966_v16 }
 0x462   :  { %v893_v41 = vpop.xlane.xlu1 %892  ;;  %v969_v22 = vsel %vm857_vm2, %v3447_v37, 0.0 }
 0x463   :  { %2921 = vpow2.f32 %v940_v13  ;;  %v942_v42 = vmul.f32 1.442695, %v916_v38  ;;  %v917_v44 = vsub.f32 %v3389_v33, %v893_v41  ;;  %970 = vadd.xlane.f32.xlu1 %v969_v22 }
 0x464   :  { %v896_v25 = vpop.xlane.xlu0 %895 }
 0x465   :  { %2923 = vpow2.f32 %v942_v42  ;;  %v944_v45 = vmul.f32 1.442695, %v917_v44  ;;  %v918_v47 = vsub.f32 %v3393_v36, %v896_v25 }
 0x466   :  { %v899_v48 = vpop.xlane.xlu1 %898 }
 0x467   :  { %v3454_v49 = vpop.eup %2915  ;;  %2925 = vpow2.f32 %v944_v45  ;;  %v946_v28 = vmul.f32 1.442695, %v918_v47  ;;  %v919_v50 = vsub.f32 %v3397_v40, %v899_v48 }
 0x468   :  { %v902_v51 = vpop.xlane.xlu0 %901  ;;  %v972_v52 = vsel %vm857_vm2, %v3454_v49, 0.0 }
 0x469   :  { %v3459_v53 = vpop.eup %2917  ;;  %2927 = vpow2.f32 %v946_v28  ;;  %v948_v33 = vmul.f32 1.442695, %v919_v50  ;;  %v920_v55 = vsub.f32 %v3401_v43, %v902_v51  ;;  %973 = vadd.xlane.f32.xlu0 %v972_v52 }
 0x46a   :  { %v975_v36 = vsel %vm857_vm2, %v3459_v53, 0.0  ;;  %v465_v6 = vpop.permute.xlu1 %464 }
 0x46b   :  { %v3464_v58 = vpop.eup %2919  ;;  %2929 = vpow2.f32 %v948_v33  ;;  %v950_v60 = vmul.f32 1.442695, %v920_v55  ;;  %976 = vadd.xlane.f32.xlu1 %v975_v36 }
 0x46c   :  { %v978_v40 = vsel %vm857_vm2, %v3464_v58, 0.0  ;;  %v463_v24 = vpop.permute.xlu0 %462 }
 0x46d   :  { %v3468_v61 = vpop.eup %2921  ;;  %2931 = vpow2.f32 %v950_v60  ;;  %979 = vadd.xlane.f32.xlu0 %v978_v40 }
 0x46e   :  { %v981_v62 = vsel %vm857_vm2, %v3468_v61, 0.0  ;;  %v469_v15 = vpop.permute.xlu1 %468 }
 0x46f   :  { %v3472_v43 = vpop.eup %2923  ;;  %982 = vadd.xlane.f32.xlu1 %v981_v62 }
 0x470   :  { %v984_v1 = vsel %vm857_vm2, %v3472_v43, 0.0 }
 0x471   :  { %v3476_v2 = vpop.eup %2925  ;;  %985 = vadd.xlane.f32.xlu0 %v984_v1 }
 0x472   :  { %v987_v3 = vsel %vm857_vm2, %v3476_v2, 0.0 }
 0x473   :  { %v3480_v4 = vpop.eup %2927  ;;  %988 = vadd.xlane.f32.xlu1 %v987_v3 }
 0x474   :  { %v990_v7 = vsel %vm857_vm2, %v3480_v4, 0.0 }
 0x475   :  { %v3484_v10 = vpop.eup %2929  ;;  %991 = vadd.xlane.f32.xlu0 %v990_v7 }
 0x476   :  { %v993_v63 = vsel %vm857_vm2, %v3484_v10, 0.0 }
 0x477   :  { %v3488_v11 = vpop.eup %2931  ;;  %994 = vadd.xlane.f32.xlu1 %v993_v63 }
 0x478   :  { %v996_v14 = vsel %vm857_vm2, %v3488_v11, 0.0 }
 0x479   :  { %997 = vadd.xlane.f32.xlu0 %v996_v14 }
 0x48f   :  { %474 = vrot.lane.b32.xlu0 %v3290_v31, %s3137_s21 }
 0x49d   :  { %v956_v26 = vpop.xlane.xlu0 %955 }
 0x49f   :  { %v905_v17 = vpop.xlane.xlu1 %904 }
 0x4a0   :  { %v921_v18 = vsub.f32 %v3405_v46, %v905_v17 }
 0x4a1   :  { %v962_v31 = vpop.xlane.xlu0 %961 }
 0x4a2   :  { %v952_v20 = vmul.f32 1.442695, %v921_v18 }
 0x4a3   :  { %v3501_v27 = vpop.permute.xlu1 %470 }
 0x4a4   :  { %2933 = vpow2.f32 %v952_v20 }
 0x4a5   :  { %2935 = vrcp.f32 %v956_v26 }
 0x4ae   :  { %v3495_v21 = vpop.eup %2933 }
 0x4af   :  { %v999_v23 = vsel %vm857_vm2, %v3495_v21, 0.0  ;;  %v2936_v9 = vpop.eup %2935 }
 0x4b0   :  { %1000 = vadd.xlane.f32.xlu1 %v999_v23  ;;  %v1018_v34 = vmul.f32 %v2936_v9, %v3415_v54 }
 0x4c1   :  { %476 = vrot.lane.b32.xlu1 %v3288_v29, %s3137_s21 }
 0x4d4   :  { %v959_v30 = vpop.xlane.xlu1 %958 }
 0x4d5   :  { %2937 = vrcp.f32 %v959_v30 }
 0x4d6   :  { %2939 = vrcp.f32 %v962_v31 }
 0x4d8   :  { %v965_v46 = vpop.xlane.xlu1 %964 }
 0x4d9   :  { %2941 = vrcp.f32 %v965_v46 }
 0x4df   :  { %v2938_v12 = vpop.eup %2937 }
 0x4e0   :  { %v1019_v35 = vmul.f32 %v2938_v12, %v3429_v5  ;;  %v2940_v16 = vpop.eup %2939 }
 0x4e1   :  { %v1020_v38 = vmul.f32 %v2940_v16, %v3419_v57 }
 0x4e2   :  { %v1034_v13 = vpack.c.bf16 %v1019_v35, %v1018_v34 }
 0x4e3   :  { %v2942_v29 = vpop.eup %2941 }
 0x4e4   :  { %v1021_v41 = vmul.f32 %v2942_v29, %v3433_v8  ;;  %2661 = vmatmul.mubr.msk.bf16.vlgmr.msra.gmra.mrb[16].mxu1 %vm857_vm2, %v1034_v13 }
 0x4e5   :  { %2671 = vmatpush3.bf16.msra.mxu1 %v463_v24  ;;  %2672 = vmatprep.mubr.msk.bf16.mxu1 %vm3135_vm0, %v3134_v19 }
 0x4e6   :  { %v1035_v22 = vpack.c.bf16 %v1021_v41, %v1020_v38  ;;  %2682 = vmatprep.subr.bf16.mxu1 %v3134_v19 }
 0x4e8   :  { %2667 = vmatmul.mubr.msk.bf16.vlgmr.msra.gmra.mrb[28].mxu0 %vm857_vm2, %v1035_v22 }
 0x4e9   :  { %2677 = vmatpush3.bf16.msra.mxu0 %v465_v6  ;;  %2678 = vmatprep.mubr.msk.bf16.mxu0 %vm3135_vm0, %v3134_v19 }
 0x4ea   :  { %2688 = vmatprep.subr.bf16.mxu0 %v3134_v19 }
 0x4ee   :  { %v968_v54 = vpop.xlane.xlu0 %967 }
 0x4ef   :  { %2943 = vrcp.f32 %v968_v54 }
 0x4f0   :  { %v971_v57 = vpop.xlane.xlu1 %970 }
 0x4f1   :  { %2945 = vrcp.f32 %v971_v57 }
 0x4f6   :  { %v974_v5 = vpop.xlane.xlu0 %973 }
 0x4f7   :  { %2947 = vrcp.f32 %v974_v5 }
 0x4f8   :  { %v977_v8 = vpop.xlane.xlu1 %976 }
 0x4f9   :  { %v2944_v42 = vpop.eup %2943  ;;  %2949 = vrcp.f32 %v977_v8 }
 0x4fa   :  { %v980_v44 = vpop.xlane.xlu0 %979  ;;  %v1022_v45 = vmul.f32 %v2944_v42, %v3442_v32 }
 0x4fb   :  { %v2946_v25 = vpop.eup %2945  ;;  %2951 = vrcp.f32 %v980_v44 }
 0x4fc   :  { %v1023_v47 = vmul.f32 %v2946_v25, %v3447_v37  ;;  %v983_v48 = vpop.xlane.xlu1 %982 }
 0x4fd   :  { %2953 = vrcp.f32 %v983_v48  ;;  %v2807_v48 = vld [vmem:[#allocation7] sm:$0xff]  }
 0x4fe   :  { %v986_v28 = vpop.xlane.xlu0 %985  ;;  %v1036_v50 = vpack.c.bf16 %v1023_v47, %v1022_v45 }
 0x4ff   :  { %2955 = vrcp.f32 %v986_v28  ;;  %v2808_v28 = vld [vmem:[#allocation7 + $0x8] sm:$0xff]  }
 0x500   :  { %v989_v51 = vpop.xlane.xlu1 %988  ;;  %2673 = vmatmul.mubr.msk.bf16.vlgmr.msra.gmra.mrb[20].mxu1 %vm857_vm2, %v1036_v50 }
 0x501   :  { %v2948_v52 = vpop.eup %2947  ;;  %2957 = vrcp.f32 %v989_v51  ;;  %2683 = vmatpush3.bf16.msra.mxu1 %v469_v15  ;;  %2684 = vmatprep.mubr.msk.bf16.mxu1 %vm3135_vm0, %v3134_v19 }
 0x502   :  { %v992_v33 = vpop.xlane.xlu0 %991  ;;  %2694 = vmatprep.subr.bf16.mxu1 %v3134_v19  ;;  %v1024_v37 = vmul.f32 %v2948_v52, %v3454_v49 }
 0x503   :  { %v2950_v32 = vpop.eup %2949  ;;  %2959 = vrcp.f32 %v992_v33 }
 0x504   :  { %v1025_v55 = vmul.f32 %v2950_v32, %v3459_v53  ;;  %v995_v36 = vpop.xlane.xlu1 %994 }
 0x505   :  { %v2952_v60 = vpop.eup %2951  ;;  %2961 = vrcp.f32 %v995_v36 }
 0x506   :  { %v998_v40 = vpop.xlane.xlu0 %997  ;;  %v1037_v62 = vpack.c.bf16 %v1025_v55, %v1024_v37  ;;  %v1026_v3 = vmul.f32 %v2952_v60, %v3464_v58  ;;  %v2809_v37 = vld [vmem:[#allocation7 + $0x10] sm:$0xff]  }
 0x507   :  { %v2954_v1 = vpop.eup %2953  ;;  %2963 = vrcp.f32 %v998_v40  ;;  %v2810_v40 = vld [vmem:[#allocation7 + $0x18] sm:$0xff]  }
 0x508   :  { %v1027_v7 = vmul.f32 %v2954_v1, %v3468_v61  ;;  %2679 = vmatmul.mubr.msk.bf16.vlgmr.msra.gmra.mrb[32].mxu0 %vm857_vm2, %v1037_v62  ;;  %v2811_v62 = vld [vmem:[#allocation7 + $0x20] sm:$0xff]   ;;  %v2812_v1 = vld [vmem:[#allocation7 + $0x28] sm:$0xff]  }
 0x509   :  { %v2956_v63 = vpop.eup %2955  ;;  %2689 = vmatpush3.bf16.msra.mxu0 %v3501_v27  ;;  %2690 = vmatprep.mubr.msk.bf16.mxu0 %vm3135_vm0, %v3134_v19 }
 0x50a   :  { %v475_v49 = vpop.permute.xlu0 %474  ;;  %v1038_v53 = vpack.c.bf16 %v1027_v7, %v1026_v3  ;;  %2700 = vmatprep.subr.bf16.mxu0 %v3134_v19  ;;  %v1028_v6 = vmul.f32 %v2956_v63, %v3472_v43  ;;  %v2813_v3 = vld [vmem:[#allocation7 + $0x30] sm:$0xff]   ;;  %v2814_v7 = vld [vmem:[#allocation7 + $0x38] sm:$0xff]  }
 0x50b   :  { %v2958_v14 = vpop.eup %2957 }
 0x50c   :  { %v1029_v15 = vmul.f32 %v2958_v14, %v3476_v2  ;;  %2685 = vmatmul.mubr.msk.bf16.vlgmr.msra.gmra.mrb[24].mxu1 %vm857_vm2, %v1038_v53 }
 0x50d   :  { %v2960_v58 = vpop.eup %2959  ;;  %2695 = vmatpush3.bf16.msra.mxu1 %v475_v49  ;;  %2696 = vmatprep.mubr.msk.bf16.mxu1 %vm3135_vm0, %v3134_v19 }
 0x50e   :  { %v1039_v61 = vpack.c.bf16 %v1029_v15, %v1028_v6  ;;  %v1030_v18 = vmul.f32 %v2960_v58, %v3480_v4  ;;  %2706 = vmatprep.subr.bf16.mxu1 %v2807_v48 }
 0x50f   :  { %v2962_v17 = vpop.eup %2961 }
 0x510   :  { %v1031_v20 = vmul.f32 %v2962_v17, %v3484_v10  ;;  %2691 = vmatmul.mubr.msk.bf16.vlgmr.msra.gmra.mrb[36].mxu0 %vm857_vm2, %v1039_v61 }
 0x511   :  { %2702 = vmatprep.mubr.msk.bf16.mxu0 %vm3135_vm0, %v3134_v19  ;;  %v2964_v24 = vpop.eup %2963 }
 0x512   :  { %v1040_v43 = vpack.c.bf16 %v1031_v20, %v1030_v18  ;;  %v1032_v27 = vmul.f32 %v2964_v24, %v3488_v11 }
 0x514   :  { %2697 = vmatmul.mubr.msk.bf16.vlgmr.msra.gmra.mrb[28].mxu1 %vm857_vm2, %v1040_v43 }
 0x515   :  { %2707 = vmatpush3.bf16.msra.mxu1 %v2807_v48 }
 0x516   :  { %2708 = vmatprep.subr.bf16.mxu1 %v2808_v28 }
 0x519   :  { %2709 = vmatpush3.bf16.msra.mxu1 %v2808_v28 }
 0x51a   :  { %2710 = vmatprep.subr.bf16.mxu1 %v2809_v37 }
 0x51d   :  { %2711 = vmatpush3.bf16.msra.mxu1 %v2809_v37  ;;  %v2978_v37 = vld [vmem:[#allocation2 + $0x10] sm:$0xff] }
 0x51e   :  { %2712 = vmatprep.subr.bf16.mxu1 %v2810_v40 }
 0x521   :  { %2713 = vmatpush3.bf16.msra.mxu1 %v2810_v40 }
 0x522   :  { %2714 = vmatprep.subr.bf16.mxu1 %v2811_v62 }
 0x525   :  { %2715 = vmatpush3.bf16.msra.mxu1 %v2811_v62  ;;  %v2815_v62 = vld [vmem:[#allocation8] ss:$16 sps:$4 sm:$0xff]  }
 0x526   :  { %2716 = vmatprep.subr.bf16.mxu1 %v2812_v1 }
 0x529   :  { %2717 = vmatpush3.bf16.msra.mxu1 %v2812_v1  ;;  %v2817_v1 = vld [vmem:[#allocation8 + $0x4] ss:$16 sps:$4 sm:$0xff]  }
 0x52a   :  { %2718 = vmatprep.subr.bf16.mxu1 %v2813_v3 }
 0x52d   :  { %2719 = vmatpush3.bf16.msra.mxu1 %v2813_v3  ;;  %v2818_v3 = vld [vmem:[#allocation8 + $0x8] ss:$16 sps:$4 sm:$0xff]  }
 0x52e   :  { %2720 = vmatprep.subr.bf16.mxu1 %v2814_v7 }
 0x531   :  { %2721 = vmatpush3.bf16.msra.mxu1 %v2814_v7  ;;  %v2820_v7 = vld [vmem:[#allocation8 + $0xc] ss:$16 sps:$4 sm:$0xff]  }
 0x532   :  { %1908 = vmatprep.subr.bf16.mxu1 %v2820_v7 }
 0x53d   :  { %v1001_v2 = vpop.xlane.xlu1 %1000 }
 0x53e   :  { %2965 = vrcp.f32 %v1001_v2 }
 0x541   :  { %v477_v23 = vpop.permute.xlu1 %476 }
 0x542   :  { %2701 = vmatpush3.bf16.msra.mxu0 %v477_v23 }
 0x543   :  { %1855 = vmatprep.subr.bf16.mxu0 %v2817_v1 }
 0x548   :  { %v2966_v26 = vpop.eup %2965 }
 0x549   :  { %v1033_v4 = vmul.f32 %v2966_v26, %v3495_v21 }
 0x54b   :  { %v1041_v10 = vpack.c.bf16 %v1033_v4, %v1032_v27 }
 0x54d   :  { %2703 = vmatmul.mubr.msk.bf16.vlgmr.msra.gmra.mrb[40].mxu0 %vm857_vm2, %v1041_v10 }
 0x54e   :  { %1887 = vmatprep.mubr.bf16.mxu0 %v3133_v39  ;;  %1856 = vmatpush1.bf16.msra.mxu0 %v2815_v62 }
 0x5b7   :  { %v3545_v19 = vpop.f32.mrb[16].mxu1 }
 0x5b8   :  { %v2662_v31 = vpop.f32.mrb[17].mxu1 }
 0x5b9   :  { %v3547_v30 = vpop.f32.mrb[18].mxu1 }
 0x5ba   :  { %v2663_v46 = vpop.f32.mrb[19].mxu1 }
 0x5bb   :  { %v3549_v9 = vpop.f32.mrb[28].mxu0 }
 0x5bc   :  { %v2668_v12 = vpop.f32.mrb[29].mxu0 }
 0x5bd   :  { %v3551_v34 = vpop.f32.mrb[30].mxu0 }
 0x5be   :  { %v2669_v35 = vpop.f32.mrb[31].mxu0 }
 0x5d3   :  { %v1167_v11 = vpop.f32.mrb[20].mxu1 }
 0x5d4   :  { %v2674_v16 = vpop.f32.mrb[21].mxu1 }
 0x5d5   :  { %v1170_v21 = vpop.f32.mrb[22].mxu1 }
 0x5d6   :  { %v2745_v13 = vpack.i.bf16 %v1170_v21, %v1167_v11  ;;  %v2675_v29 = vpop.f32.mrb[23].mxu1 }
 0x5d8   :  { %2746 = vrot.lane.b32.xlu0 %v2745_v13, %s3137_s21 }
 0x5db   :  { %v1211_v38 = vpop.f32.mrb[32].mxu0 }
 0x5dc   :  { %v2680_v41 = vpop.f32.mrb[33].mxu0 }
 0x5dd   :  { %v1214_v22 = vpop.f32.mrb[34].mxu0 }
 0x5de   :  { %v2750_v54 = vpack.i.bf16 %v1214_v22, %v1211_v38  ;;  %v2681_v57 = vpop.f32.mrb[35].mxu0 }
 0x5df   :  { %v1255_v5 = vpop.f32.mrb[24].mxu1 }
 0x5e0   :  { %2751 = vrot.lane.b32.xlu1 %v2750_v54, %s3137_s21  ;;  %v2686_v8 = vpop.f32.mrb[25].mxu1 }
 0x5e1   :  { %v1258_v42 = vpop.f32.mrb[26].mxu1 }
 0x5e2   :  { %v2755_v44 = vpack.i.bf16 %v1258_v42, %v1255_v5  ;;  %v2687_v25 = vpop.f32.mrb[27].mxu1  ;;  %v1476_v42 = vsub.s32 4, %v3263_v56 }
 0x5e3   :  { %v1299_v45 = vpop.f32.mrb[36].mxu0 }
 0x5e4   :  { %2756 = vrot.lane.b32.xlu0 %v2755_v44, %s3130_s0  ;;  %v2692_v47 = vpop.f32.mrb[37].mxu0 }
 0x5e5   :  { %v1302_v50 = vpop.f32.mrb[38].mxu0 }
 0x5e6   :  { %v2760_v51 = vpack.i.bf16 %v1302_v50, %v1299_v45  ;;  %v2693_v52 = vpop.f32.mrb[39].mxu0  ;;  %v2976_v50 = vld [vmem:[#allocation2] sm:$0xff] }
 0x5e7   :  { %v1343_v33 = vpop.f32.mrb[28].mxu1 }
 0x5e8   :  { %2761 = vrot.lane.b32.xlu1 %v2760_v51, %s3130_s0  ;;  %v2698_v32 = vpop.f32.mrb[29].mxu1 }
 0x5e9   :  { %v1346_v55 = vpop.f32.mrb[30].mxu1 }
 0x5ea   :  { %v2765_v36 = vpack.i.bf16 %v1346_v55, %v1343_v33  ;;  %v2699_v60 = vpop.f32.mrb[31].mxu1  ;;  %v2977_v33 = vld [vmem:[#allocation2 + $0x8] sm:$0xff] }
 0x5eb   :  { %v2979_v60 = vld [vmem:[#allocation2 + $0x18] sm:$0xff] }
 0x5ec   :  { %2766 = vrot.lane.b32.xlu0 %v2765_v36, %s3136_s20 }
 0x620   :  { %v1387_v63 = vpop.f32.mrb[40].mxu0 }
 0x621   :  { %v2704_v49 = vpop.f32.mrb[41].mxu0 }
 0x622   :  { %v1390_v53 = vpop.f32.mrb[42].mxu0  ;;  %v2826_v49 = vld [vmem:[#allocation8 + $0x2c] ss:$16 sps:$4 sm:$0xff]  }
 0x623   :  { %v2770_v14 = vpack.i.bf16 %v1390_v53, %v1387_v63  ;;  %v2705_v6 = vpop.f32.mrb[43].mxu0  ;;  %v2823_v63 = vld [vmem:[#allocation8 + $0x24] ss:$16 sps:$4 sm:$0xff]   ;;  %v2821_v53 = vld [vmem:[#allocation8 + $0x20] ss:$16 sps:$4 sm:$0xff]  }
 0x624   :  { %1857 = vmatprep.subr.bf16.mxu0 %v2823_v63 }
 0x625   :  { %2771 = vrot.lane.b32.xlu1 %v2770_v14, %s3136_s20  ;;  %v2824_v14 = vld [vmem:[#allocation8 + $0x28] ss:$16 sps:$4 sm:$0xff]   ;;  %1858 = vmatpush1.bf16.msra.mxu0 %v2821_v53  ;;  %v1625_v53 = vsub.s32 2, %v3263_v56 }
 0x64a   :  { %v2747_v15 = vpop.permute.xlu0 %2746 }
 0x64b   :  { %v2749_v61 = vunpack.i.h.bf16 %v2747_v15  ;;  %v2748_v17 = vunpack.i.l.bf16 %v2747_v15 }
 0x64d   :  { %v1443_v2 = vsel %vm480_vm1, %v3547_v30, %v2749_v61  ;;  %v1442_v23 = vsel %vm480_vm1, %v3545_v19, %v2748_v17 }
 0x652   :  { %v2752_v12 = vpop.permute.xlu1 %2751 }
 0x653   :  { %v2754_v11 = vunpack.i.h.bf16 %v2752_v12  ;;  %v2753_v16 = vunpack.i.l.bf16 %v2752_v12  ;;  %v2832_v12 = vld [vmem:[#allocation8 + $0x4c] ss:$16 sps:$4 sm:$0xff]  }
 0x655   :  { %v1445_v19 = vsel %vm480_vm1, %v3551_v34, %v2754_v11  ;;  %v1444_v29 = vsel %vm480_vm1, %v3549_v9, %v2753_v16  ;;  %v3580_v9 = vld [vmem:[%s3666_s5] sm:$0xff]  ;;  %v2830_v11 = vld [vmem:[#allocation8 + $0x48] ss:$16 sps:$4 sm:$0xff]  }
 0x656   :  { %v2757_v58 = vpop.permute.xlu0 %2756  ;;  %v1477_v34 = vrot.slane %v3580_v9, %v1476_v42  ;;  %v2835_v16 = vld [vmem:[#allocation8 + $0x64] ss:$16 sps:$4 sm:$0xff]   ;;  %v2856_v42 = vld [vmem:[#allocation8 + $0xcc] ss:$16 sps:$4 sm:$0xff]  }
 0x657   :  { %v2759_v18 = vunpack.i.h.bf16 %v2757_v58  ;;  %v2758_v20 = vunpack.i.l.bf16 %v2757_v58 }
 0x659   :  { %v1447_v27 = vsel %vm1446_vm3, %v1442_v23, %v2758_v20  ;;  %v1448_v4 = vsel %vm1446_vm3, %v1443_v2, %v2759_v18 }
 0x65a   :  { %v2762_v35 = vpop.permute.xlu1 %2761 }
 0x65b   :  { %v2764_v30 = vunpack.i.h.bf16 %v2762_v35  ;;  %v2763_v21 = vunpack.i.l.bf16 %v2762_v35  ;;  %v2827_v35 = vld [vmem:[#allocation8 + $0x40] ss:$16 sps:$4 sm:$0xff]  }
 0x65d   :  { %v1450_v22 = vsel %vm1446_vm3, %v1445_v19, %v2764_v30  ;;  %v1449_v54 = vsel %vm1446_vm3, %v1444_v29, %v2763_v21  ;;  %v2838_v30 = vld [vmem:[#allocation8 + $0x6c] ss:$16 sps:$4 sm:$0xff]   ;;  %v2833_v21 = vld [vmem:[#allocation8 + $0x60] ss:$16 sps:$4 sm:$0xff]   ;;  %v2841_v19 = vld [vmem:[#allocation8 + $0x84] ss:$16 sps:$4 sm:$0xff]  }
 0x65e   :  { %v2767_v43 = vpop.permute.xlu0 %2766  ;;  %v2844_v29 = vld [vmem:[#allocation8 + $0x8c] ss:$16 sps:$4 sm:$0xff]  }
 0x65f   :  { %v2769_v24 = vunpack.i.h.bf16 %v2767_v43  ;;  %v2768_v26 = vunpack.i.l.bf16 %v2767_v43 }
 0x661   :  { %v1452_v10 = vsel %vm1451_vm4, %v1447_v27, %v2768_v26  ;;  %v1453_v31 = vsel %vm1451_vm4, %v1448_v4, %v2769_v24 }
 0x662   :  { %v1456_v46 = vpack.c.bf16 %v1453_v31, %v1452_v10 }
 0x664   :  { %2722 = vmatprep.mubr.bf16.mxu1 %v1456_v46  ;;  %v2829_v46 = vld [vmem:[#allocation8 + $0x44] ss:$16 sps:$4 sm:$0xff]  }
 0x665   :  { %1859 = vmatprep.subr.bf16.mxu0 %v2829_v46 }
 0x666   :  { %1860 = vmatpush1.bf16.msra.mxu0 %v2827_v35 }
 0x667   :  { %1861 = vmatprep.subr.bf16.mxu0 %v2835_v16  ;;  %v2865_v16 = vld [vmem:[#allocation10] sm:$0xff]  }
 0x66a   :  { %1862 = vmatpush1.bf16.msra.mxu0 %v2833_v21  ;;  %v2868_v21 = vld [vmem:[#allocation10 + $0xc8] sm:$0xff]  }
 0x66b   :  { %1863 = vmatprep.subr.bf16.mxu0 %v2841_v19 }
 0x697   :  { %v2772_v13 = vpop.permute.xlu1 %2771 }
 0x698   :  { %v2774_v38 = vunpack.i.h.bf16 %v2772_v13  ;;  %v2773_v41 = vunpack.i.l.bf16 %v2772_v13  ;;  %v2836_v13 = vld [vmem:[#allocation8 + $0x68] ss:$16 sps:$4 sm:$0xff]  }
 0x69a   :  { %v1455_v57 = vsel %vm1451_vm4, %v1450_v22, %v2774_v38  ;;  %v1454_v5 = vsel %vm1451_vm4, %v1449_v54, %v2773_v41  ;;  %v2839_v38 = vld [vmem:[#allocation8 + $0x80] ss:$16 sps:$4 sm:$0xff]   ;;  %v2842_v41 = vld [vmem:[#allocation8 + $0x88] ss:$16 sps:$4 sm:$0xff]   ;;  %v2847_v22 = vld [vmem:[#allocation8 + $0xa4] ss:$16 sps:$4 sm:$0xff]  }
 0x69b   :  { %v1457_v8 = vpack.c.bf16 %v1455_v57, %v1454_v5  ;;  %1864 = vmatpush1.bf16.msra.mxu0 %v2839_v38  ;;  %v2850_v54 = vld [vmem:[#allocation8 + $0xac] ss:$16 sps:$4 sm:$0xff]   ;;  %v2845_v57 = vld [vmem:[#allocation8 + $0xa0] ss:$16 sps:$4 sm:$0xff]   ;;  %v2848_v5 = vld [vmem:[#allocation8 + $0xa8] ss:$16 sps:$4 sm:$0xff]  }
 0x69c   :  { %1865 = vmatprep.subr.bf16.mxu0 %v2847_v22  ;;  %v2872_v38 = vld [vmem:[#allocation10 + $0xd0] sm:$0xff]  }
 0x69d   :  { %2723 = vmatmul.mubr.bf16.vlgmr.msra.gmra.mrb[32].mxu1 %v1457_v8  ;;  %v2853_v8 = vld [vmem:[#allocation8 + $0xc4] ss:$16 sps:$4 sm:$0xff]  }
 0x69e   :  { %1940 = vmatprep.mubr.bf16.mxu1 %v3133_v39  ;;  %1909 = vmatpush1.bf16.msra.mxu1 %v2818_v3 }
 0x69f   :  { %1910 = vmatprep.subr.bf16.mxu1 %v2826_v49  ;;  %1866 = vmatpush1.bf16.msra.mxu0 %v2845_v57  ;;  %v2874_v57 = vld [vmem:[#allocation10 + $0x90] sm:$0xff]  }
 0x6a0   :  { %1867 = vmatprep.subr.bf16.mxu0 %v2853_v8  ;;  %v2876_v8 = vld [vmem:[#allocation10 + $0xd8] sm:$0xff]  }
 0x6a2   :  { %1911 = vmatpush1.bf16.msra.mxu1 %v2824_v14 }
 0x6a3   :  { %1912 = vmatprep.subr.bf16.mxu1 %v2832_v12 }
 0x6a6   :  { %1913 = vmatpush1.bf16.msra.mxu1 %v2830_v11 }
 0x6a7   :  { %1914 = vmatprep.subr.bf16.mxu1 %v2838_v30  ;;  %v2867_v30 = vld [vmem:[#allocation10 + $0x48] sm:$0xff]  }
 0x6aa   :  { %1915 = vmatpush1.bf16.msra.mxu1 %v2836_v13 }
 0x6ab   :  { %1916 = vmatprep.subr.bf16.mxu1 %v2844_v29  ;;  %v2870_v29 = vld [vmem:[#allocation10 + $0x88] sm:$0xff]  }
 0x6ae   :  { %1917 = vmatpush1.bf16.msra.mxu1 %v2842_v41 }
 0x6af   :  { %1918 = vmatprep.subr.bf16.mxu1 %v2850_v54  ;;  %v2873_v54 = vld [vmem:[#allocation10 + $0x10] sm:$0xff]  }
 0x6b2   :  { %1919 = vmatpush1.bf16.msra.mxu1 %v2848_v5  ;;  %v2875_v5 = vld [vmem:[#allocation10 + $0x58] sm:$0xff]  }
 0x6b3   :  { %1920 = vmatprep.subr.bf16.mxu1 %v2856_v42  ;;  %v2878_v42 = vld [vmem:[#allocation10 + $0x98] sm:$0xff]  }
 0x770   :  { %v2724_v44 = vpop.f32.mrb[32].mxu1 }
 0x771   :  { %v1560_v25 = vpop.f32.mrb[33].mxu1  ;;  %v1569_v28 = vadd.f32 %v2724_v44, %v1477_v34  ;;  %v2854_v44 = vld [vmem:[#allocation8 + $0xc8] ss:$16 sps:$4 sm:$0xff]  }
 0x772   :  { %v1561_v45 = vadd.f32 %v1560_v25, %v1477_v34  ;;  %v2725_v47 = vpop.f32.mrb[34].mxu1  ;;  %v2859_v25 = vld [vmem:[#allocation8 + $0xe4] ss:$16 sps:$4 sm:$0xff]   ;;  %1921 = vmatpush1.bf16.msra.mxu1 %v2854_v44 }
 0x773   :  { %v1563_v48 = vpop.f32.mrb[35].mxu1  ;;  %v3588_v55 = vadd.f32 %v2978_v37, %v1569_v28  ;;  %v1572_v36 = vadd.f32 %v2725_v47, %v1477_v34  ;;  %v2857_v47 = vld [vmem:[#allocation8 + $0xe0] ss:$16 sps:$4 sm:$0xff]  }
 0x774   :  { %v3583_v51 = vadd.f32 %v2976_v50, %v1561_v45  ;;  %v1564_v52 = vadd.f32 %v1563_v48, %v1477_v34  ;;  %v2851_v34 = vld [vmem:[#allocation8 + $0xc0] ss:$16 sps:$4 sm:$0xff]   ;;  %v2862_v45 = vld [vmem:[#allocation8 + $0xec] ss:$16 sps:$4 sm:$0xff]   ;;  %v2860_v48 = vld [vmem:[#allocation8 + $0xe8] ss:$16 sps:$4 sm:$0xff]  }
 0x775   :  { %v3592_v40 = vadd.f32 %v2979_v60, %v1572_v36  ;;  %1868 = vmatpush1.bf16.msra.mxu0 %v2851_v34  ;;  %1922 = vmatprep.subr.bf16.mxu1 %v2862_v45  ;;  %v2863_v28 = vld [vmem:[#allocation10 + $0x40] sm:$0xff]  }
 0x776   :  { %v3585_v32 = vadd.f32 %v2977_v33, %v1564_v52  ;;  %1579 = vadd.xlane.f32.xlu0 %v3583_v51  ;;  %1869 = vmatprep.subr.bf16.mxu0 %v2859_v25  ;;  %v2864_v50 = vld [vmem:[#allocation10 + $0xc0] sm:$0xff]  }
 0x777   :  { %1923 = vmatpush1.bf16.msra.mxu1 %v2860_v48  ;;  %v2879_v34 = vld [vmem:[#allocation10 + $0x60] sm:$0xff]   ;;  %v2884_v48 = vld [vmem:[#allocation10 + $0xe8] sm:$0xff]  }
 0x778   :  { %1581 = vadd.xlane.f32.xlu1 %v3585_v32  ;;  %2562 = vmatprep.subr.bf16.mxu1 %v2864_v50  ;;  %v2880_v44 = vld [vmem:[#allocation10 + $0xe0] sm:$0xff]   ;;  %v2886_v50 = vld [vmem:[#allocation10 + $0xa8] sm:$0xff]  }
 0x779   :  { %1870 = vmatpush1.bf16.msra.mxu0 %v2857_v47  ;;  %v2881_v25 = vld [vmem:[#allocation10 + $0x20] sm:$0xff]   ;;  %v2883_v47 = vld [vmem:[#allocation10 + $0x68] sm:$0xff]  }
 0x77a   :  { %1583 = vadd.xlane.f32.xlu0 %v3588_v55  ;;  %2534 = vmatprep.subr.bf16.mxu0 %v2863_v28  ;;  %v2882_v45 = vld [vmem:[#allocation10 + $0xa0] sm:$0xff]   ;;  %v2885_v28 = vld [vmem:[#allocation10 + $0x28] sm:$0xff]  }
 0x77e   :  { %1585 = vadd.xlane.f32.xlu0 %v3592_v40 }
 0x803   :  { %v1580_v6 = vpop.xlane.xlu0 %1579 }
 0x804   :  { %v1587_v15 = vmul.f32 0.0078125, %v1580_v6  ;;  %v1626_v6 = vrot.slane %v3580_v9, %v1625_v53 }
 0x805   :  { %v1582_v58 = vpop.xlane.xlu1 %1581 }
 0x806   :  { %v3596_v61 = vsub.f32 %v3583_v51, %v1587_v15  ;;  %v1588_v17 = vmul.f32 0.0078125, %v1582_v58  ;;  %v1633_v15 = vsub.s32 3, %v3263_v56 }
 0x807   :  { %v1584_v18 = vpop.xlane.xlu0 %1583 }
 0x808   :  { %v3599_v20 = vsub.f32 %v3585_v32, %v1588_v17  ;;  %v1589_v43 = vmul.f32 0.0078125, %v1584_v18  ;;  %v1595_v2 = vmul.f32 %v3596_v61, %v3596_v61 }
 0x80a   :  { %v3604_v23 = vsub.f32 %v3588_v55, %v1589_v43  ;;  %1599 = vadd.xlane.f32.xlu0 %v1595_v2  ;;  %v1596_v24 = vmul.f32 %v3599_v20, %v3599_v20 }
 0x80b   :  { %v1586_v26 = vpop.xlane.xlu0 %1585 }
 0x80c   :  { %v1590_v27 = vmul.f32 0.0078125, %v1586_v26  ;;  %1601 = vadd.xlane.f32.xlu1 %v1596_v24  ;;  %v1597_v4 = vmul.f32 %v3604_v23, %v3604_v23  ;;  %v1634_v24 = vrot.slane %v3580_v9, %v1633_v15 }
 0x80e   :  { %v3611_v10 = vsub.f32 %v3592_v40, %v1590_v27  ;;  %1603 = vadd.xlane.f32.xlu0 %v1597_v4 }
 0x810   :  { %v1598_v31 = vmul.f32 %v3611_v10, %v3611_v10 }
 0x812   :  { %1605 = vadd.xlane.f32.xlu1 %v1598_v31 }
 0x897   :  { %v1600_v52 = vpop.xlane.xlu0 %1599 }
 0x898   :  { %v1607_v33 = vmul.f32 0.0078125, %v1600_v52  ;;  %v2887_v52 = vld [vmem:[#allocation10 + $0x70] sm:$0xff]  }
 0x899   :  { %v1602_v37 = vpop.xlane.xlu1 %1601 }
 0x89a   :  { %v1611_v36 = vadd.f32 1e-05, %v1607_v33  ;;  %v1608_v60 = vmul.f32 0.0078125, %v1602_v37  ;;  %v2888_v33 = vld [vmem:[#allocation10 + $0xf0] sm:$0xff]  }
 0x89b   :  { %v1604_v62 = vpop.xlane.xlu0 %1603  ;;  %v2889_v37 = vld [vmem:[#allocation10 + $0x30] sm:$0xff]  }
 0x89c   :  { %2967 = vrsqrt.f32 %v1611_v36  ;;  %v1612_v1 = vadd.f32 1e-05, %v1608_v60  ;;  %v1609_v3 = vmul.f32 0.0078125, %v1604_v62  ;;  %v2890_v36 = vld [vmem:[#allocation10 + $0xb0] sm:$0xff]   ;;  %v2891_v60 = vld [vmem:[#allocation10 + $0x78] sm:$0xff]  }
 0x89d   :  { %v2892_v62 = vld [vmem:[#allocation10 + $0xf8] sm:$0xff]  }
 0x89e   :  { %2969 = vrsqrt.f32 %v1612_v1  ;;  %v1613_v7 = vadd.f32 1e-05, %v1609_v3  ;;  %v2893_v1 = vld [vmem:[#allocation10 + $0x38] sm:$0xff]  }
 0x89f   :  { %v1606_v63 = vpop.xlane.xlu1 %1605  ;;  %v2894_v3 = vld [vmem:[#allocation10 + $0xb8] sm:$0xff]  }
 0x8a0   :  { %2971 = vrsqrt.f32 %v1613_v7  ;;  %v1610_v49 = vmul.f32 0.0078125, %v1606_v63  ;;  %v1673_v7 = vld [vmem:[%s3667_s6] sm:$0xf]  ;;  %s3138_s6 = smov [#allocation11]  }
 0x8a1   :  { %v1678_v63 = vrot.slane %v1673_v7, %v148_v59  ;;  %s2356_s1 = sshll.u32 %s3138_s6, 4  ;;  %s2357_s1 = int_to_ptr.vmem [resolvable:$true] %s2356_s1 }
 0x8a2   :  { %v1614_v14 = vadd.f32 1e-05, %v1610_v49  ;;  %v1686_v49 = vrot.slane %v1673_v7, %v1625_v53  ;;  %s3090_s25 = scalar_lea.vmem %s2357_s1, 512  ;;  %p3095_p13 = scmp.lt.s32.totalorder %s2357_s1, %s2357_s1 }
 0x8a3   :  { %p3091_p12 = scmp.ne.s32.totalorder %s2357_s1, %s3090_s25  ;;  %p3096_p0 = scmp.lt.s32.totalorder %s3090_s25, %s3090_s25 }
 0x8a4   :  { %2973 = vrsqrt.f32 %v1614_v14  ;;  %v1682_v14 = vrot.slane %v1673_v7, %v156_v0 }
 0x8a5   :  { %p3097_p1 = por %p3096_p0, %p3095_p13 }
 0x8a6   :  { %v2968_v58 = vpop.eup %2967 }
 0x8a7   :  { %v1619_v17 = vmul.f32 %v2968_v58, %v3596_v61  ;;  %v2866_v61 = vld [vmem:[#allocation10 + $0x80] sm:$0xff]   ;;  %p3098_p2 = pnand %p3097_p1, %p3091_p12 }
 0x8a8   :  { %v2970_v18 = vpop.eup %2969 }
 0x8a9   :  { %v1620_v43 = vmul.f32 %v2970_v18, %v3599_v20  ;;  %v1627_v2 = vmul.f32 %v1626_v6, %v1619_v17 }
 0x8aa   :  { %v2972_v26 = vpop.eup %2971 }
 0x8ab   :  { %v1628_v27 = vmul.f32 %v1626_v6, %v1620_v43  ;;  %v1635_v4 = vadd.f32 %v1634_v24, %v1627_v2  ;;  %v1621_v46 = vmul.f32 %v2972_v26, %v3604_v23  ;;  %v2869_v23 = vld [vmem:[#allocation10 + $0x8] sm:$0xff]  }
 0x8ad   :  { %v1636_v31 = vadd.f32 %v1634_v24, %v1628_v27  ;;  %v1629_v20 = vmul.f32 %v1626_v6, %v1621_v46 }
 0x8ae   :  { %v2974_v12 = vpop.eup %2973 }
 0x8af   :  { %v1639_v35 = vpack.c.bf16 %v1636_v31, %v1635_v4  ;;  %v1622_v11 = vmul.f32 %v2974_v12, %v3611_v10  ;;  %v2871_v10 = vld [vmem:[#allocation10 + $0x50] sm:$0xff]   ;;  %v1637_v41 = vadd.f32 %v1634_v24, %v1629_v20 }
 0x8b1   :  { %1888 = vmatmul.mubr.bf16.vlgmr.msra.gmra.mrb[44].mxu0 %v1639_v35  ;;  %1941 = vmatmul.mubr.bf16.vlgmr.msra.gmra.mrb[36].mxu1 %v1639_v35  ;;  %v1630_v13 = vmul.f32 %v1626_v6, %v1622_v11  ;;  %v1690_v6 = vrot.slane %v1673_v7, %v1633_v15 }
 0x8b2   :  { %1897 = vmatprep.mubr.bf16.mxu0 %v3133_v39  ;;  %1950 = vmatprep.mubr.bf16.mxu1 %v3133_v39  ;;  %v2877_v39 = vld [vmem:[#allocation10 + $0x18] sm:$0xff]  }
 0x8b3   :  { %v1638_v19 = vadd.f32 %v1634_v24, %v1630_v13  ;;  %2535 = vmatpush3.bf16.msra.mxu0 %v2865_v16  ;;  %2563 = vmatpush3.bf16.msra.mxu1 %v2866_v61 }
 0x8b4   :  { %2536 = vmatprep.subr.bf16.mxu0 %v2867_v30  ;;  %2564 = vmatprep.subr.bf16.mxu1 %v2868_v21 }
 0x8b5   :  { %v1640_v22 = vpack.c.bf16 %v1638_v19, %v1637_v41 }
 0x8b7   :  { %2537 = vmatpush3.bf16.msra.mxu0 %v2869_v23  ;;  %2565 = vmatpush3.bf16.msra.mxu1 %v2870_v29 }
 0x8b8   :  { %2538 = vmatprep.subr.bf16.mxu0 %v2871_v10  ;;  %2566 = vmatprep.subr.bf16.mxu1 %v2872_v38 }
 0x8b9   :  { %1898 = vmatmul.mubr.bf16.gmra.mrb[48].mxu0 %v1640_v22  ;;  %1951 = vmatmul.mubr.bf16.gmra.mrb[40].mxu1 %v1640_v22 }
 0x8bb   :  { %2539 = vmatpush3.bf16.msra.mxu0 %v2873_v54  ;;  %2567 = vmatpush3.bf16.msra.mxu1 %v2874_v57 }
 0x8bc   :  { %2540 = vmatprep.subr.bf16.mxu0 %v2875_v5  ;;  %2568 = vmatprep.subr.bf16.mxu1 %v2876_v8 }
 0x8bf   :  { %2541 = vmatpush3.bf16.msra.mxu0 %v2877_v39  ;;  %2569 = vmatpush3.bf16.msra.mxu1 %v2878_v42 }
 0x8c0   :  { %2542 = vmatprep.subr.bf16.mxu0 %v2879_v34  ;;  %2570 = vmatprep.subr.bf16.mxu1 %v2880_v44 }
 0x8c3   :  { %2543 = vmatpush3.bf16.msra.mxu0 %v2881_v25  ;;  %2571 = vmatpush3.bf16.msra.mxu1 %v2882_v45 }
 0x8c4   :  { %2544 = vmatprep.subr.bf16.mxu0 %v2883_v47  ;;  %2572 = vmatprep.subr.bf16.mxu1 %v2884_v48 }
 0x8c7   :  { %2545 = vmatpush3.bf16.msra.mxu0 %v2885_v28  ;;  %2573 = vmatpush3.bf16.msra.mxu1 %v2886_v50 }
 0x8c8   :  { %2546 = vmatprep.subr.bf16.mxu0 %v2887_v52  ;;  %2574 = vmatprep.subr.bf16.mxu1 %v2888_v33 }
 0x8cb   :  { %2547 = vmatpush3.bf16.msra.mxu0 %v2889_v37  ;;  %2575 = vmatpush3.bf16.msra.mxu1 %v2890_v36 }
 0x8cc   :  { %2548 = vmatprep.subr.bf16.mxu0 %v2891_v60  ;;  %2576 = vmatprep.subr.bf16.mxu1 %v2892_v62 }
 0x8cf   :  { %2549 = vmatpush3.bf16.msra.mxu0 %v2893_v1  ;;  %2577 = vmatpush3.bf16.msra.mxu1 %v2894_v3 }
 0x984   :  { %v1889_v58 = vpop.f32.mrb[44].mxu0  ;;  %v1942_v17 = vpop.f32.mrb[36].mxu1 }
 0x985   :  { %v1890_v18 = vadd.f32 %v1889_v58, %v1678_v63  ;;  %v1943_v43 = vadd.f32 %v1942_v17, %v1686_v49  ;;  %v1891_v2 = vpop.f32.mrb[45].mxu0  ;;  %v1944_v24 = vpop.f32.mrb[37].mxu1 }
 0x986   :  { %v1892_v26 = vadd.f32 %v1891_v2, %v1682_v14  ;;  %v1945_v27 = vadd.f32 %v1944_v24, %v1690_v6  ;;  %v1893_v4 = vpop.f32.mrb[46].mxu0  ;;  %v1946_v31 = vpop.f32.mrb[38].mxu1 }
 0x987   :  { %v1894_v59 = vadd.f32 %v1893_v4, %v1678_v63  ;;  %v1947_v46 = vadd.f32 %v1946_v31, %v1686_v49  ;;  %v1895_v12 = vpop.f32.mrb[47].mxu0  ;;  %v1948_v53 = vpop.f32.mrb[39].mxu1  ;;  %v1961_v0 = vmax.f32 %v1890_v18, 0.0  ;;  %v1963_v16 = vmax.f32 %v1943_v43, 0.0 }
 0x988   :  { %v1896_v35 = vadd.f32 %v1895_v12, %v1682_v14  ;;  %v1949_v11 = vadd.f32 %v1948_v53, %v1690_v6  ;;  %v1962_v30 = vmax.f32 %v1892_v26, 0.0  ;;  %v1964_v21 = vmax.f32 %v1945_v27, 0.0 }
 0x989   :  { %v1965_v61 = vmax.f32 %v1894_v59, 0.0  ;;  %v1967_v15 = vmax.f32 %v1947_v46, 0.0 }
 0x98a   :  { %v1966_v20 = vmax.f32 %v1896_v35, 0.0  ;;  %v1968_v13 = vmax.f32 %v1949_v11, 0.0 }
 0x98b   :  { %v1977_v19 = vpack.c.bf16 %v1965_v61, %v1961_v0  ;;  %v1979_v23 = vpack.c.bf16 %v1967_v15, %v1963_v16 }
 0x98c   :  { %v1978_v29 = vpack.c.bf16 %v1966_v20, %v1962_v30  ;;  %v1980_v10 = vpack.c.bf16 %v1968_v13, %v1964_v21  ;;  %v1899_v38 = vpop.f32.mrb[48].mxu0  ;;  %v1952_v41 = vpop.f32.mrb[40].mxu1 }
 0x98d   :  { %v1900_v22 = vadd.f32 %v1899_v38, %v1678_v63  ;;  %v1953_v54 = vadd.f32 %v1952_v41, %v1686_v49  ;;  %v1901_v57 = vpop.f32.mrb[49].mxu0  ;;  %v1954_v5 = vpop.f32.mrb[41].mxu1 }
 0x98e   :  { %v1902_v8 = vadd.f32 %v1901_v57, %v1682_v14  ;;  %v1955_v39 = vadd.f32 %v1954_v5, %v1690_v6  ;;  %v1903_v42 = vpop.f32.mrb[50].mxu0  ;;  %v1956_v34 = vpop.f32.mrb[42].mxu1  ;;  %2277 = vmatprep.mubr.bf16.mxu0 %v1978_v29  ;;  %2326 = vmatprep.mubr.bf16.mxu1 %v1980_v10 }
 0x98f   :  { %v1904_v44 = vadd.f32 %v1903_v42, %v1678_v63  ;;  %v1957_v25 = vadd.f32 %v1956_v34, %v1686_v49  ;;  %v1905_v45 = vpop.f32.mrb[51].mxu0  ;;  %v1958_v47 = vpop.f32.mrb[43].mxu1  ;;  %2278 = vmatmul.mubr.bf16.vlgmr.msra.gmra.mrb[52].mxu0 %v1977_v19  ;;  %2327 = vmatmul.mubr.bf16.vlgmr.msra.gmra.mrb[44].mxu1 %v1979_v23  ;;  %v1969_v50 = vmax.f32 %v1900_v22, 0.0  ;;  %v1971_v52 = vmax.f32 %v1953_v54, 0.0 }
 0x990   :  { %v1906_v48 = vadd.f32 %v1905_v45, %v1682_v14  ;;  %v1959_v28 = vadd.f32 %v1958_v47, %v1690_v6  ;;  %v1970_v36 = vmax.f32 %v1902_v8, 0.0  ;;  %v1972_v60 = vmax.f32 %v1955_v39, 0.0 }
 0x991   :  { %v1973_v33 = vmax.f32 %v1904_v44, 0.0  ;;  %v1975_v37 = vmax.f32 %v1957_v25, 0.0  ;;  %v2051_v63 = vsub.s32 5, %v3263_v56 }
 0x992   :  { %v1974_v62 = vmax.f32 %v1906_v48, 0.0  ;;  %v1976_v1 = vmax.f32 %v1959_v28, 0.0 }
 0x993   :  { %v1981_v3 = vpack.c.bf16 %v1973_v33, %v1969_v50  ;;  %v1983_v7 = vpack.c.bf16 %v1975_v37, %v1971_v52  ;;  %v2052_v6 = vrot.slane %v3580_v9, %v2051_v63 }
 0x994   :  { %v1982_v58 = vpack.c.bf16 %v1974_v62, %v1970_v36  ;;  %v1984_v17 = vpack.c.bf16 %v1976_v1, %v1972_v60 }
 0x996   :  { %2285 = vmatprep.mubr.bf16.mxu0 %v1982_v58  ;;  %2334 = vmatprep.mubr.bf16.mxu1 %v1984_v17 }
 0x997   :  { %2286 = vmatmul.mubr.bf16.gmra.mrb[56].mxu0 %v1981_v3  ;;  %2335 = vmatmul.mubr.bf16.gmra.mrb[48].mxu1 %v1983_v7 }
 0xa62   :  { %v2550_v49 = vpop.f32.mrb[52].mxu0  ;;  %v2578_v14 = vpop.f32.mrb[44].mxu1 }
 0xa63   :  { %v2551_v18 = vpop.f32.mrb[53].mxu0  ;;  %v2579_v43 = vpop.f32.mrb[45].mxu1 }
 0xa64   :  { %v2552_v2 = vadd.f32 %v2551_v18, %v2550_v49  ;;  %v2580_v24 = vadd.f32 %v2579_v43, %v2578_v14  ;;  %v2553_v26 = vpop.f32.mrb[54].mxu0  ;;  %v2581_v27 = vpop.f32.mrb[46].mxu1 }
 0xa65   :  { %v2554_v4 = vpop.f32.mrb[55].mxu0  ;;  %v2582_v31 = vpop.f32.mrb[47].mxu1 }
 0xa66   :  { %v2280_v59 = vadd.f32 %v2552_v2, %v2052_v6  ;;  %v2555_v46 = vadd.f32 %v2554_v4, %v2553_v26  ;;  %v2583_v12 = vadd.f32 %v2582_v31, %v2581_v27 }
 0xa68   :  { %v2329_v53 = vadd.f32 %v2580_v24, %v2280_v59  ;;  %v2283_v35 = vadd.f32 %v2555_v46, %v2052_v6 }
 0xa6a   :  { %v2343_v11 = vadd.f32 %v2329_v53, %v3583_v51  ;;  %v2332_v56 = vadd.f32 %v2583_v12, %v2283_v35  ;;  %v2556_v0 = vpop.f32.mrb[56].mxu0  ;;  %v2584_v16 = vpop.f32.mrb[48].mxu1 }
 0xa6b   :  { %v2557_v61 = vpop.f32.mrb[57].mxu0  ;;  %v2585_v9 = vpop.f32.mrb[49].mxu1 }
 0xa6c   :  { %2347 = vst [vmem:[#allocation11] sm:$0xff] %v2343_v11  ;;  %v2344_v15 = vadd.f32 %v2332_v56, %v3585_v32  ;;  %v2558_v30 = vadd.f32 %v2557_v61, %v2556_v0  ;;  %v2586_v21 = vadd.f32 %v2585_v9, %v2584_v16  ;;  %v2559_v20 = vpop.f32.mrb[58].mxu0  ;;  %v2587_v13 = vpop.f32.mrb[50].mxu1 }
 0xa6d   :  { %v2560_v19 = vpop.f32.mrb[59].mxu0  ;;  %v2588_v23 = vpop.f32.mrb[51].mxu1 }
 0xa6e   :  { %2348 = vst [vmem:[#allocation11 + $0x8] sm:$0xff] %v2344_v15  ;;  %v2288_v29 = vadd.f32 %v2558_v30, %v2052_v6  ;;  %v2561_v10 = vadd.f32 %v2560_v19, %v2559_v20  ;;  %v2589_v38 = vadd.f32 %v2588_v23, %v2587_v13 }
 0xa70   :  { %v2337_v41 = vadd.f32 %v2586_v21, %v2288_v29  ;;  %v2291_v51 = vadd.f32 %v2561_v10, %v2052_v6 }
 0xa72   :  { %v2345_v22 = vadd.f32 %v2337_v41, %v3588_v55  ;;  %v2340_v54 = vadd.f32 %v2589_v38, %v2291_v51 }
 0xa74   :  { %2349 = vst [vmem:[#allocation11 + $0x10] sm:$0xff] %v2345_v22  ;;  %v2346_v32 = vadd.f32 %v2340_v54, %v3592_v40 }
 0xa76   :  { %2350 = vst [vmem:[#allocation11 + $0x18] sm:$0xff] %v2346_v32 }
 0xa77   :  { %3101 = shalt.err (!%p3098_p2)
}
 0xa78   :  { %s3102_s27 = scalar_lea.hbm %s3668_s7, 512 }
 0xa79   :  { %p3103_p3 = scmp.ne.s32.totalorder %s3668_s7, %s3102_s27  ;;  %p3106_p4 = scmp.lt.u32.totalorder %s3102_s27, %s3668_s7 }
 0xa7b   :  { %p3108_p5 = pnand %p3106_p4, %p3103_p3 }
 0xa7d   :  { %3111 = shalt.err (!%p3108_p5)
}
 0xa7e   :  { %2362 = dma.vmem_to_hbm [thread:$0]  %s2357_s1, 512, %s3668_s7, [#allocation4], %s3127_s3, %s3127_s3, %s3128_s15  }
 0xa7f   :  { %3118 = dma.done.wait [#allocation4], 512  }
 0xa80   :  { %3119 = vsyncadd [#allocation4], 4294966784 }
 0xa81   :  { %2366 = vsyncpa [#allocation3], 1 }
 0xa82   :  { %2367 = vsyncpa [#allocation6], 1 }
 0xa83   :  { %2368 = vsyncpa [#allocation9], 1 }
 0xa84   :  { %2369 = vsyncpa [#allocation4], 1 }

</bundles_post_ra>
